<compile_context>
chip_gen: v5e
topology: v5e:2x2
jax: 0.10.0
libtpu: 0.0.40
codegen_flags: <defaults>
</compile_context>

<pallas_src>
import functools

import jax
import jax.numpy as jnp
from jax.experimental import pallas as pl
from jax.experimental.pallas import tpu as pltpu


_SQRT_HALF = 0.7071067811865476


def _erf(z):
    # Abramowitz & Stegun 7.1.26, |err| < 1.5e-7 -> exact-GELU within f32 tolerance.
    # Kept hand-rolled (exp/abs/where/mul/add only) so lowering is guaranteed; the exp
    # goes to the EUP slot and the element count here is tiny (N*Cout*512).
    a1, a2, a3, a4, a5 = 0.254829592, -0.284496736, 1.421413741, -1.453152027, 1.061405429
    p = 0.3275911
    s = jnp.where(z >= 0.0, 1.0, -1.0)
    az = jnp.abs(z)
    t = 1.0 / (1.0 + p * az)
    poly = ((((a5 * t + a4) * t + a3) * t + a2) * t + a1) * t
    return s * (1.0 - poly * jnp.exp(-az * az))


def _fused_kernel(p_ref, w_ref, b_ref, g_ref, bt_ref, o_ref, *, eps):
    # p_ref : (16, Cin*9, Q)  -- 16 pool-window candidates of the im2col patches
    # w_ref : (Cout, Cin*9)   b_ref: (Cout, 1)   g_ref/bt_ref: (1, Q)   o_ref: (Cout, Q)
    w = w_ref[...]
    # Conv-as-GEMM fused with MaxPool2d(4): max-accumulate over the 16 window candidates.
    v = jnp.dot(w, p_ref[0], preferred_element_type=jnp.float32)
    for k in range(1, 16):
        v = jnp.maximum(v, jnp.dot(w, p_ref[k], preferred_element_type=jnp.float32))
    v = v + b_ref[...]                                   # conv bias (commutes with max)
    # TODO(synk): Dropout2d(p=0.2) is treated as inference-mode identity (no RNG channel
    # mask / 1/(1-p) scaling).
    v = jnp.clip(v, 0.0, 6.0)                            # ReLU6
    mean = jnp.mean(v, axis=-1, keepdims=True)           # LayerNorm([32,16]) over flat Q
    d = v - mean
    var = jnp.mean(d * d, axis=-1, keepdims=True)
    v = d * jax.lax.rsqrt(var + eps)
    v = v * g_ref[...] + bt_ref[...]                     # LayerNorm affine
    v = 0.5 * v * (1.0 + _erf(v * _SQRT_HALF))           # GELU (exact, erf-based)
    o_ref[...] = jnp.tanh(v)                             # tanh


def model_tanh_forward(x, params):
    w, b = params["conv_w"], params["conv_b"]
    gamma, beta = params["ln_gamma"], params["ln_beta"]

    N, Cin, H, W = x.shape
    Cout = w.shape[0]
    HO, WO = H - 2, W - 2                                # conv output spatial
    assert HO % 4 == 0 and WO % 4 == 0
    HP, WP = HO // 4, WO // 4                            # pooled spatial
    assert gamma.shape == (HP, WP) and beta.shape == (HP, WP)
    Q = HP * WP                                          # lane-dense flattened spatial

    # --- Glue (pure data movement in XLA): im2col with the 16 pool-window candidates
    # exposed as a leading axis.
    #   patches[n, dh*4+dw, c*9+kh*3+kw, hp*WP+wp] = x[n, c, 4*hp+dh+kh, 4*wp+dw+kw]
    cols = [x[:, :, kh:kh + HO, kw:kw + WO] for kh in range(3) for kw in range(3)]
    im2col = jnp.stack(cols, axis=2)                     # (N, Cin, 9, HO, WO)
    t = im2col.reshape(N, Cin, 9, HP, 4, WP, 4)
    patches = t.transpose(0, 4, 6, 1, 2, 3, 5).reshape(N, 16, Cin * 9, Q)

    w2 = w.reshape(Cout, Cin * 9)                        # columns ordered (c, kh, kw)
    b2 = b.reshape(Cout, 1)
    g2 = gamma.reshape(1, Q)
    bt2 = beta.reshape(1, Q)

    kernel = functools.partial(_fused_kernel, eps=1e-5)
    out = pl.pallas_call(
        kernel,
        out_shape=jax.ShapeDtypeStruct((N, Cout, Q), jnp.float32),
        grid_spec=pltpu.PrefetchScalarGridSpec(
            num_scalar_prefetch=0,
            grid=(N,),
            in_specs=[
                pl.BlockSpec((None, 16, Cin * 9, Q), lambda n: (n, 0, 0, 0)),
                pl.BlockSpec((Cout, Cin * 9), lambda n: (0, 0)),
                pl.BlockSpec((Cout, 1), lambda n: (0, 0)),
                pl.BlockSpec((1, Q), lambda n: (0, 0)),
                pl.BlockSpec((1, Q), lambda n: (0, 0)),
            ],
            out_specs=pl.BlockSpec((None, Cout, Q), lambda n: (n, 0, 0)),
        ),
        compiler_params=pltpu.CompilerParams(
            dimension_semantics=("parallel",)),
    )(patches, w2, b2, g2, bt2)

    return out.reshape(N, Cout, HP, WP)                  # back to NCHW


if __name__ == "__main__":
    key = jax.random.PRNGKey(0)
    kx, kw, kb, kg, kbt = jax.random.split(key, 5)

    # Spatial size implied by the forward: LayerNorm([32, 16]) after conv(3x3)+maxpool(4)
    # requires input spatial (130, 66).
    N, Cin, H, W = 2, 4, 130, 66
    x = jax.random.normal(kx, (N, Cin, H, W), dtype=jnp.float32)

    params = {
        "conv_w": 0.1 * jax.random.normal(kw, (16, Cin, 3, 3), dtype=jnp.float32),
        "conv_b": 0.05 * jax.random.normal(kb, (16,), dtype=jnp.float32),
        "ln_gamma": 1.0 + 0.1 * jax.random.normal(kg, (32, 16), dtype=jnp.float32),
        "ln_beta": 0.1 * jax.random.normal(kbt, (32, 16), dtype=jnp.float32),
    }

    out = jax.jit(model_tanh_forward)(x, params)
    out = jax.block_until_ready(out)
    assert out.shape == (N, 16, 32, 16) and out.dtype == jnp.float32
    print("KERNEL_OK")
</pallas_src>

<mosaic_0001>
module attributes {stable_mosaic.version = 11 : i64} {
  func.func @_fused_kernel(%arg0: i32, %arg1: memref<1x16x36x512xf32, #tpu.memory_space<vmem>>, %arg2: memref<16x36xf32, #tpu.memory_space<vmem>>, %arg3: memref<16x1xf32, #tpu.memory_space<vmem>>, %arg4: memref<1x512xf32, #tpu.memory_space<vmem>>, %arg5: memref<1x512xf32, #tpu.memory_space<vmem>>, %arg6: memref<1x16x512xf32, #tpu.memory_space<vmem>>) attributes {dimension_semantics = [#tpu.dimension_semantics<parallel>], iteration_bounds = array<i64: 2>, scalar_prefetch = 0 : i64, scratch_operands = 0 : i64, tpu.core_type = #tpu.core_type<tc>, window_params = [{transform_indices = @transform_0, window_bounds = array<i64: 1, 16, 36, 512>}, {pipeline_mode = #tpu.pipeline_mode<synchronous>, transform_indices = @transform_1, window_bounds = array<i64: 16, 36>}, {pipeline_mode = #tpu.pipeline_mode<synchronous>, transform_indices = @transform_2, window_bounds = array<i64: 16, 1>}, {pipeline_mode = #tpu.pipeline_mode<synchronous>, transform_indices = @transform_3, window_bounds = array<i64: 1, 512>}, {pipeline_mode = #tpu.pipeline_mode<synchronous>, transform_indices = @transform_4, window_bounds = array<i64: 1, 512>}, {transform_indices = @transform_5, window_bounds = array<i64: 1, 16, 512>}]} {
    %c0 = arith.constant 0 : index
    %c0_0 = arith.constant 0 : index
    %0 = vector.load %arg2[%c0, %c0_0] : memref<16x36xf32, #tpu.memory_space<vmem>>, vector<16x36xf32>
    %c0_1 = arith.constant 0 : index
    %c0_2 = arith.constant 0 : index
    %c0_3 = arith.constant 0 : index
    %c0_4 = arith.constant 0 : index
    %1 = vector.load %arg1[%c0_1, %c0_2, %c0_3, %c0_4] : memref<1x16x36x512xf32, #tpu.memory_space<vmem>>, vector<1x1x36x512xf32>
    %2 = vector.shape_cast %1 : vector<1x1x36x512xf32> to vector<36x512xf32>
    %cst = arith.constant dense<0.000000e+00> : vector<16x512xf32>
    %3 = tpu.matmul %0, %2, %cst {dimension_numbers = #tpu.dot_dimension_numbers<[1], [0], [0], [1], [0, 0, 1, 1], [], []>} : vector<16x36xf32>, vector<36x512xf32>, vector<16x512xf32> -> vector<16x512xf32>
    %c0_5 = arith.constant 0 : index
    %c1 = arith.constant 1 : index
    %c0_6 = arith.constant 0 : index
    %c0_7 = arith.constant 0 : index
    %4 = vector.load %arg1[%c0_5, %c1, %c0_6, %c0_7] : memref<1x16x36x512xf32, #tpu.memory_space<vmem>>, vector<1x1x36x512xf32>
    %5 = vector.shape_cast %4 : vector<1x1x36x512xf32> to vector<36x512xf32>
    %cst_8 = arith.constant dense<0.000000e+00> : vector<16x512xf32>
    %6 = tpu.matmul %0, %5, %cst_8 {dimension_numbers = #tpu.dot_dimension_numbers<[1], [0], [0], [1], [0, 0, 1, 1], [], []>} : vector<16x36xf32>, vector<36x512xf32>, vector<16x512xf32> -> vector<16x512xf32>
    %7 = arith.maximumf %3, %6 : vector<16x512xf32>
    %c0_9 = arith.constant 0 : index
    %c2 = arith.constant 2 : index
    %c0_10 = arith.constant 0 : index
    %c0_11 = arith.constant 0 : index
    %8 = vector.load %arg1[%c0_9, %c2, %c0_10, %c0_11] : memref<1x16x36x512xf32, #tpu.memory_space<vmem>>, vector<1x1x36x512xf32>
    %9 = vector.shape_cast %8 : vector<1x1x36x512xf32> to vector<36x512xf32>
    %cst_12 = arith.constant dense<0.000000e+00> : vector<16x512xf32>
    %10 = tpu.matmul %0, %9, %cst_12 {dimension_numbers = #tpu.dot_dimension_numbers<[1], [0], [0], [1], [0, 0, 1, 1], [], []>} : vector<16x36xf32>, vector<36x512xf32>, vector<16x512xf32> -> vector<16x512xf32>
    %11 = arith.maximumf %7, %10 : vector<16x512xf32>
    %c0_13 = arith.constant 0 : index
    %c3 = arith.constant 3 : index
    %c0_14 = arith.constant 0 : index
    %c0_15 = arith.constant 0 : index
    %12 = vector.load %arg1[%c0_13, %c3, %c0_14, %c0_15] : memref<1x16x36x512xf32, #tpu.memory_space<vmem>>, vector<1x1x36x512xf32>
    %13 = vector.shape_cast %12 : vector<1x1x36x512xf32> to vector<36x512xf32>
    %cst_16 = arith.constant dense<0.000000e+00> : vector<16x512xf32>
    %14 = tpu.matmul %0, %13, %cst_16 {dimension_numbers = #tpu.dot_dimension_numbers<[1], [0], [0], [1], [0, 0, 1, 1], [], []>} : vector<16x36xf32>, vector<36x512xf32>, vector<16x512xf32> -> vector<16x512xf32>
    %15 = arith.maximumf %11, %14 : vector<16x512xf32>
    %c0_17 = arith.constant 0 : index
    %c4 = arith.constant 4 : index
    %c0_18 = arith.constant 0 : index
    %c0_19 = arith.constant 0 : index
    %16 = vector.load %arg1[%c0_17, %c4, %c0_18, %c0_19] : memref<1x16x36x512xf32, #tpu.memory_space<vmem>>, vector<1x1x36x512xf32>
    %17 = vector.shape_cast %16 : vector<1x1x36x512xf32> to vector<36x512xf32>
    %cst_20 = arith.constant dense<0.000000e+00> : vector<16x512xf32>
    %18 = tpu.matmul %0, %17, %cst_20 {dimension_numbers = #tpu.dot_dimension_numbers<[1], [0], [0], [1], [0, 0, 1, 1], [], []>} : vector<16x36xf32>, vector<36x512xf32>, vector<16x512xf32> -> vector<16x512xf32>
    %19 = arith.maximumf %15, %18 : vector<16x512xf32>
    %c0_21 = arith.constant 0 : index
    %c5 = arith.constant 5 : index
    %c0_22 = arith.constant 0 : index
    %c0_23 = arith.constant 0 : index
    %20 = vector.load %arg1[%c0_21, %c5, %c0_22, %c0_23] : memref<1x16x36x512xf32, #tpu.memory_space<vmem>>, vector<1x1x36x512xf32>
    %21 = vector.shape_cast %20 : vector<1x1x36x512xf32> to vector<36x512xf32>
    %cst_24 = arith.constant dense<0.000000e+00> : vector<16x512xf32>
    %22 = tpu.matmul %0, %21, %cst_24 {dimension_numbers = #tpu.dot_dimension_numbers<[1], [0], [0], [1], [0, 0, 1, 1], [], []>} : vector<16x36xf32>, vector<36x512xf32>, vector<16x512xf32> -> vector<16x512xf32>
    %23 = arith.maximumf %19, %22 : vector<16x512xf32>
    %c0_25 = arith.constant 0 : index
    %c6 = arith.constant 6 : index
    %c0_26 = arith.constant 0 : index
    %c0_27 = arith.constant 0 : index
    %24 = vector.load %arg1[%c0_25, %c6, %c0_26, %c0_27] : memref<1x16x36x512xf32, #tpu.memory_space<vmem>>, vector<1x1x36x512xf32>
    %25 = vector.shape_cast %24 : vector<1x1x36x512xf32> to vector<36x512xf32>
    %cst_28 = arith.constant dense<0.000000e+00> : vector<16x512xf32>
    %26 = tpu.matmul %0, %25, %cst_28 {dimension_numbers = #tpu.dot_dimension_numbers<[1], [0], [0], [1], [0, 0, 1, 1], [], []>} : vector<16x36xf32>, vector<36x512xf32>, vector<16x512xf32> -> vector<16x512xf32>
    %27 = arith.maximumf %23, %26 : vector<16x512xf32>
    %c0_29 = arith.constant 0 : index
    %c7 = arith.constant 7 : index
    %c0_30 = arith.constant 0 : index
    %c0_31 = arith.constant 0 : index
    %28 = vector.load %arg1[%c0_29, %c7, %c0_30, %c0_31] : memref<1x16x36x512xf32, #tpu.memory_space<vmem>>, vector<1x1x36x512xf32>
    %29 = vector.shape_cast %28 : vector<1x1x36x512xf32> to vector<36x512xf32>
    %cst_32 = arith.constant dense<0.000000e+00> : vector<16x512xf32>
    %30 = tpu.matmul %0, %29, %cst_32 {dimension_numbers = #tpu.dot_dimension_numbers<[1], [0], [0], [1], [0, 0, 1, 1], [], []>} : vector<16x36xf32>, vector<36x512xf32>, vector<16x512xf32> -> vector<16x512xf32>
    %31 = arith.maximumf %27, %30 : vector<16x512xf32>
    %c0_33 = arith.constant 0 : index
    %c8 = arith.constant 8 : index
    %c0_34 = arith.constant 0 : index
    %c0_35 = arith.constant 0 : index
    %32 = vector.load %arg1[%c0_33, %c8, %c0_34, %c0_35] : memref<1x16x36x512xf32, #tpu.memory_space<vmem>>, vector<1x1x36x512xf32>
    %33 = vector.shape_cast %32 : vector<1x1x36x512xf32> to vector<36x512xf32>
    %cst_36 = arith.constant dense<0.000000e+00> : vector<16x512xf32>
    %34 = tpu.matmul %0, %33, %cst_36 {dimension_numbers = #tpu.dot_dimension_numbers<[1], [0], [0], [1], [0, 0, 1, 1], [], []>} : vector<16x36xf32>, vector<36x512xf32>, vector<16x512xf32> -> vector<16x512xf32>
    %35 = arith.maximumf %31, %34 : vector<16x512xf32>
    %c0_37 = arith.constant 0 : index
    %c9 = arith.constant 9 : index
    %c0_38 = arith.constant 0 : index
    %c0_39 = arith.constant 0 : index
    %36 = vector.load %arg1[%c0_37, %c9, %c0_38, %c0_39] : memref<1x16x36x512xf32, #tpu.memory_space<vmem>>, vector<1x1x36x512xf32>
    %37 = vector.shape_cast %36 : vector<1x1x36x512xf32> to vector<36x512xf32>
    %cst_40 = arith.constant dense<0.000000e+00> : vector<16x512xf32>
    %38 = tpu.matmul %0, %37, %cst_40 {dimension_numbers = #tpu.dot_dimension_numbers<[1], [0], [0], [1], [0, 0, 1, 1], [], []>} : vector<16x36xf32>, vector<36x512xf32>, vector<16x512xf32> -> vector<16x512xf32>
    %39 = arith.maximumf %35, %38 : vector<16x512xf32>
    %c0_41 = arith.constant 0 : index
    %c10 = arith.constant 10 : index
    %c0_42 = arith.constant 0 : index
    %c0_43 = arith.constant 0 : index
    %40 = vector.load %arg1[%c0_41, %c10, %c0_42, %c0_43] : memref<1x16x36x512xf32, #tpu.memory_space<vmem>>, vector<1x1x36x512xf32>
    %41 = vector.shape_cast %40 : vector<1x1x36x512xf32> to vector<36x512xf32>
    %cst_44 = arith.constant dense<0.000000e+00> : vector<16x512xf32>
    %42 = tpu.matmul %0, %41, %cst_44 {dimension_numbers = #tpu.dot_dimension_numbers<[1], [0], [0], [1], [0, 0, 1, 1], [], []>} : vector<16x36xf32>, vector<36x512xf32>, vector<16x512xf32> -> vector<16x512xf32>
    %43 = arith.maximumf %39, %42 : vector<16x512xf32>
    %c0_45 = arith.constant 0 : index
    %c11 = arith.constant 11 : index
    %c0_46 = arith.constant 0 : index
    %c0_47 = arith.constant 0 : index
    %44 = vector.load %arg1[%c0_45, %c11, %c0_46, %c0_47] : memref<1x16x36x512xf32, #tpu.memory_space<vmem>>, vector<1x1x36x512xf32>
    %45 = vector.shape_cast %44 : vector<1x1x36x512xf32> to vector<36x512xf32>
    %cst_48 = arith.constant dense<0.000000e+00> : vector<16x512xf32>
    %46 = tpu.matmul %0, %45, %cst_48 {dimension_numbers = #tpu.dot_dimension_numbers<[1], [0], [0], [1], [0, 0, 1, 1], [], []>} : vector<16x36xf32>, vector<36x512xf32>, vector<16x512xf32> -> vector<16x512xf32>
    %47 = arith.maximumf %43, %46 : vector<16x512xf32>
    %c0_49 = arith.constant 0 : index
    %c12 = arith.constant 12 : index
    %c0_50 = arith.constant 0 : index
    %c0_51 = arith.constant 0 : index
    %48 = vector.load %arg1[%c0_49, %c12, %c0_50, %c0_51] : memref<1x16x36x512xf32, #tpu.memory_space<vmem>>, vector<1x1x36x512xf32>
    %49 = vector.shape_cast %48 : vector<1x1x36x512xf32> to vector<36x512xf32>
    %cst_52 = arith.constant dense<0.000000e+00> : vector<16x512xf32>
    %50 = tpu.matmul %0, %49, %cst_52 {dimension_numbers = #tpu.dot_dimension_numbers<[1], [0], [0], [1], [0, 0, 1, 1], [], []>} : vector<16x36xf32>, vector<36x512xf32>, vector<16x512xf32> -> vector<16x512xf32>
    %51 = arith.maximumf %47, %50 : vector<16x512xf32>
    %c0_53 = arith.constant 0 : index
    %c13 = arith.constant 13 : index
    %c0_54 = arith.constant 0 : index
    %c0_55 = arith.constant 0 : index
    %52 = vector.load %arg1[%c0_53, %c13, %c0_54, %c0_55] : memref<1x16x36x512xf32, #tpu.memory_space<vmem>>, vector<1x1x36x512xf32>
    %53 = vector.shape_cast %52 : vector<1x1x36x512xf32> to vector<36x512xf32>
    %cst_56 = arith.constant dense<0.000000e+00> : vector<16x512xf32>
    %54 = tpu.matmul %0, %53, %cst_56 {dimension_numbers = #tpu.dot_dimension_numbers<[1], [0], [0], [1], [0, 0, 1, 1], [], []>} : vector<16x36xf32>, vector<36x512xf32>, vector<16x512xf32> -> vector<16x512xf32>
    %55 = arith.maximumf %51, %54 : vector<16x512xf32>
    %c0_57 = arith.constant 0 : index
    %c14 = arith.constant 14 : index
    %c0_58 = arith.constant 0 : index
    %c0_59 = arith.constant 0 : index
    %56 = vector.load %arg1[%c0_57, %c14, %c0_58, %c0_59] : memref<1x16x36x512xf32, #tpu.memory_space<vmem>>, vector<1x1x36x512xf32>
    %57 = vector.shape_cast %56 : vector<1x1x36x512xf32> to vector<36x512xf32>
    %cst_60 = arith.constant dense<0.000000e+00> : vector<16x512xf32>
    %58 = tpu.matmul %0, %57, %cst_60 {dimension_numbers = #tpu.dot_dimension_numbers<[1], [0], [0], [1], [0, 0, 1, 1], [], []>} : vector<16x36xf32>, vector<36x512xf32>, vector<16x512xf32> -> vector<16x512xf32>
    %59 = arith.maximumf %55, %58 : vector<16x512xf32>
    %c0_61 = arith.constant 0 : index
    %c15 = arith.constant 15 : index
    %c0_62 = arith.constant 0 : index
    %c0_63 = arith.constant 0 : index
    %60 = vector.load %arg1[%c0_61, %c15, %c0_62, %c0_63] : memref<1x16x36x512xf32, #tpu.memory_space<vmem>>, vector<1x1x36x512xf32>
    %61 = vector.shape_cast %60 : vector<1x1x36x512xf32> to vector<36x512xf32>
    %cst_64 = arith.constant dense<0.000000e+00> : vector<16x512xf32>
    %62 = tpu.matmul %0, %61, %cst_64 {dimension_numbers = #tpu.dot_dimension_numbers<[1], [0], [0], [1], [0, 0, 1, 1], [], []>} : vector<16x36xf32>, vector<36x512xf32>, vector<16x512xf32> -> vector<16x512xf32>
    %63 = arith.maximumf %59, %62 : vector<16x512xf32>
    %c0_65 = arith.constant 0 : index
    %c0_66 = arith.constant 0 : index
    %64 = vector.load %arg3[%c0_65, %c0_66] : memref<16x1xf32, #tpu.memory_space<vmem>>, vector<16x1xf32>
    %65 = vector.broadcast %64 : vector<16x1xf32> to vector<16x512xf32>
    %66 = arith.addf %63, %65 : vector<16x512xf32>
    %cst_67 = arith.constant 0.000000e+00 : f32
    %cst_68 = arith.constant 6.000000e+00 : f32
    %67 = vector.broadcast %cst_67 : f32 to vector<16x512xf32>
    %68 = arith.maximumf %67, %66 : vector<16x512xf32>
    %69 = vector.broadcast %cst_68 : f32 to vector<16x512xf32>
    %70 = arith.minimumf %69, %68 : vector<16x512xf32>
    %cst_69 = arith.constant dense<0.000000e+00> : vector<16xf32>
    %71 = vector.multi_reduction <add>, %70, %cst_69 [1] : vector<16x512xf32> to vector<16xf32>
    %72 = vector.shape_cast %71 : vector<16xf32> to vector<16x1xf32>
    %cst_70 = arith.constant 5.120000e+02 : f32
    %73 = vector.broadcast %cst_70 : f32 to vector<16x1xf32>
    %74 = arith.divf %72, %73 : vector<16x1xf32>
    %75 = vector.broadcast %74 : vector<16x1xf32> to vector<16x512xf32>
    %76 = arith.subf %70, %75 : vector<16x512xf32>
    %77 = arith.mulf %76, %76 : vector<16x512xf32>
    %cst_71 = arith.constant dense<0.000000e+00> : vector<16xf32>
    %78 = vector.multi_reduction <add>, %77, %cst_71 [1] : vector<16x512xf32> to vector<16xf32>
    %79 = vector.shape_cast %78 : vector<16xf32> to vector<16x1xf32>
    %cst_72 = arith.constant 5.120000e+02 : f32
    %80 = vector.broadcast %cst_72 : f32 to vector<16x1xf32>
    %81 = arith.divf %79, %80 : vector<16x1xf32>
    %cst_73 = arith.constant 9.99999974E-6 : f32
    %82 = vector.broadcast %cst_73 : f32 to vector<16x1xf32>
    %83 = arith.addf %81, %82 : vector<16x1xf32>
    %84 = math.rsqrt %83 : vector<16x1xf32>
    %85 = vector.broadcast %84 : vector<16x1xf32> to vector<16x512xf32>
    %86 = arith.mulf %76, %85 : vector<16x512xf32>
    %c0_74 = arith.constant 0 : index
    %c0_75 = arith.constant 0 : index
    %87 = vector.load %arg4[%c0_74, %c0_75] : memref<1x512xf32, #tpu.memory_space<vmem>>, vector<1x512xf32>
    %88 = vector.broadcast %87 : vector<1x512xf32> to vector<16x512xf32>
    %89 = arith.mulf %86, %88 : vector<16x512xf32>
    %c0_76 = arith.constant 0 : index
    %c0_77 = arith.constant 0 : index
    %90 = vector.load %arg5[%c0_76, %c0_77] : memref<1x512xf32, #tpu.memory_space<vmem>>, vector<1x512xf32>
    %91 = vector.broadcast %90 : vector<1x512xf32> to vector<16x512xf32>
    %92 = arith.addf %89, %91 : vector<16x512xf32>
    %cst_78 = arith.constant 5.000000e-01 : f32
    %93 = vector.broadcast %cst_78 : f32 to vector<16x512xf32>
    %94 = arith.mulf %93, %92 : vector<16x512xf32>
    %cst_79 = arith.constant 0.707106769 : f32
    %95 = vector.broadcast %cst_79 : f32 to vector<16x512xf32>
    %96 = arith.mulf %92, %95 : vector<16x512xf32>
    %cst_80 = arith.constant 0.000000e+00 : f32
    %97 = vector.broadcast %cst_80 : f32 to vector<16x512xf32>
    %98 = arith.cmpf oge, %96, %97 : vector<16x512xf32>
    %cst_81 = arith.constant 1.000000e+00 : f32
    %cst_82 = arith.constant -1.000000e+00 : f32
    %99 = vector.broadcast %cst_81 : f32 to vector<16x512xf32>
    %100 = vector.broadcast %cst_82 : f32 to vector<16x512xf32>
    %101 = arith.select %98, %99, %100 : vector<16x512xi1>, vector<16x512xf32>
    %102 = math.absf %96 : vector<16x512xf32>
    %cst_83 = arith.constant 0.327591091 : f32
    %103 = vector.broadcast %cst_83 : f32 to vector<16x512xf32>
    %104 = arith.mulf %103, %102 : vector<16x512xf32>
    %cst_84 = arith.constant 1.000000e+00 : f32
    %105 = vector.broadcast %cst_84 : f32 to vector<16x512xf32>
    %106 = arith.addf %105, %104 : vector<16x512xf32>
    %cst_85 = arith.constant 1.000000e+00 : f32
    %107 = vector.broadcast %cst_85 : f32 to vector<16x512xf32>
    %108 = arith.divf %107, %106 : vector<16x512xf32>
    %cst_86 = arith.constant 1.06140542 : f32
    %109 = vector.broadcast %cst_86 : f32 to vector<16x512xf32>
    %110 = arith.mulf %109, %108 : vector<16x512xf32>
    %cst_87 = arith.constant -1.45315206 : f32
    %111 = vector.broadcast %cst_87 : f32 to vector<16x512xf32>
    %112 = arith.addf %110, %111 : vector<16x512xf32>
    %113 = arith.mulf %112, %108 : vector<16x512xf32>
    %cst_88 = arith.constant 1.42141378 : f32
    %114 = vector.broadcast %cst_88 : f32 to vector<16x512xf32>
    %115 = arith.addf %113, %114 : vector<16x512xf32>
    %116 = arith.mulf %115, %108 : vector<16x512xf32>
    %cst_89 = arith.constant -0.284496725 : f32
    %117 = vector.broadcast %cst_89 : f32 to vector<16x512xf32>
    %118 = arith.addf %116, %117 : vector<16x512xf32>
    %119 = arith.mulf %118, %108 : vector<16x512xf32>
    %cst_90 = arith.constant 0.254829586 : f32
    %120 = vector.broadcast %cst_90 : f32 to vector<16x512xf32>
    %121 = arith.addf %119, %120 : vector<16x512xf32>
    %122 = arith.mulf %121, %108 : vector<16x512xf32>
    %cst_91 = arith.constant 0.000000e+00 : f32
    %123 = vector.broadcast %cst_91 : f32 to vector<16x512xf32>
    %124 = arith.subf %123, %102 : vector<16x512xf32>
    %125 = arith.mulf %124, %102 : vector<16x512xf32>
    %126 = math.exp %125 : vector<16x512xf32>
    %127 = arith.mulf %122, %126 : vector<16x512xf32>
    %cst_92 = arith.constant 1.000000e+00 : f32
    %128 = vector.broadcast %cst_92 : f32 to vector<16x512xf32>
    %129 = arith.subf %128, %127 : vector<16x512xf32>
    %130 = arith.mulf %101, %129 : vector<16x512xf32>
    %cst_93 = arith.constant 1.000000e+00 : f32
    %131 = vector.broadcast %cst_93 : f32 to vector<16x512xf32>
    %132 = arith.addf %131, %130 : vector<16x512xf32>
    %133 = arith.mulf %94, %132 : vector<16x512xf32>
    %134 = math.tanh %133 : vector<16x512xf32>
    %c0_94 = arith.constant 0 : index
    %c0_95 = arith.constant 0 : index
    %c0_96 = arith.constant 0 : index
    %135 = vector.load %arg6[%c0_94, %c0_95, %c0_96] : memref<1x16x512xf32, #tpu.memory_space<vmem>>, vector<1x16x512xf32>
    %136 = vector.shape_cast %135 : vector<1x16x512xf32> to vector<16x512xf32>
    %137 = vector.shape_cast %134 : vector<16x512xf32> to vector<1x16x512xf32>
    tpu.vector_store %arg6[%c0_94, %c0_95, %c0_96], %137 {strides = array<i32>} : memref<1x16x512xf32, #tpu.memory_space<vmem>>, vector<1x16x512xf32>,
    return
  }
  func.func @transform_0(%arg0: i32) -> (i32, i32, i32, i32) {
    %c0_i32 = arith.constant 0 : i32
    %c0_i32_0 = arith.constant 0 : i32
    %c0_i32_1 = arith.constant 0 : i32
    %c0_i32_2 = arith.constant 0 : i32
    return %arg0, %c0_i32, %c0_i32_0, %c0_i32_1 : i32, i32, i32, i32
  }
  func.func @transform_1(%arg0: i32) -> (i32, i32) {
    %c0_i32 = arith.constant 0 : i32
    %c0_i32_0 = arith.constant 0 : i32
    %c0_i32_1 = arith.constant 0 : i32
    return %c0_i32, %c0_i32_0 : i32, i32
  }
  func.func @transform_2(%arg0: i32) -> (i32, i32) {
    %c0_i32 = arith.constant 0 : i32
    %c0_i32_0 = arith.constant 0 : i32
    %c0_i32_1 = arith.constant 0 : i32
    return %c0_i32, %c0_i32_0 : i32, i32
  }
  func.func @transform_3(%arg0: i32) -> (i32, i32) {
    %c0_i32 = arith.constant 0 : i32
    %c0_i32_0 = arith.constant 0 : i32
    %c0_i32_1 = arith.constant 0 : i32
    return %c0_i32, %c0_i32_0 : i32, i32
  }
  func.func @transform_4(%arg0: i32) -> (i32, i32) {
    %c0_i32 = arith.constant 0 : i32
    %c0_i32_0 = arith.constant 0 : i32
    %c0_i32_1 = arith.constant 0 : i32
    return %c0_i32, %c0_i32_0 : i32, i32
  }
  func.func @transform_5(%arg0: i32) -> (i32, i32, i32) {
    %c0_i32 = arith.constant 0 : i32
    %c0_i32_0 = arith.constant 0 : i32
    %c0_i32_1 = arith.constant 0 : i32
    return %arg0, %c0_i32, %c0_i32_0 : i32, i32, i32
  }
}

</mosaic_0001>

<bundles_post_ra>
// kernel: model_tanh_forward.1
= control target key start
LH: loop header
LB: loop body
LE: loop exit
PB: predicated region body
PF: predicated region fallthrough
CT: control target
= control target key end

     0   :  { %s3507_s18 = smov 0   ;;  %s4687_s0 = inlined_call_operand.vmem [shape: f32[2,16,36,512], index: 0, kind: input, shape index: {}]   ;;  %s4688_s1 = inlined_call_operand.vmem [shape: f32[16,36], index: 1, kind: input, shape index: {}]   ;;  %s4689_s2 = inlined_call_operand.vmem [shape: f32[16,1], index: 2, kind: input, shape index: {}]   ;;  %s4690_s3 = inlined_call_operand.vmem [shape: f32[1,512], index: 3, kind: input, shape index: {}]   ;;  %s4691_s4 = inlined_call_operand.vmem [shape: f32[1,512], index: 4, kind: input, shape index: {}]   ;;  %s4692_s5 = inlined_call_operand.vmem [shape: f32[2,16,512], index: 5, kind: output, shape index: {}]  }
   0x1 LB: > { %s2894_s19 = sadd.s32 4294967295, %s3472_s18   ;;  %p2898_p0 = scmp.ge.s32.totalorder %s3472_s18, 1  ;;  %s3472_s18 = sphi %s3507_s18, %s15_s18  }
   0x2   : > { %p187_p1 = scmp.lt.s32.totalorder %s3472_s18, 3 }
   0x4   : > { %p188_p2 = pnand %p2898_p0, %p187_p1 }
   0x5   : > { %p215_p3 = scmp.lt.s32.totalorder (!%p188_p2), %s2894_s19, 1 }
   0x6   : > { %191 = sbr.rel (%p188_p2) target bundleno = 792 (0x318), region = 40 }
   0xb   : > { %s4702_s19 = smov (!%p215_p3, %s2894_s19), 1  ;;  %vm254_vm0 = vcmask 1043456   ;;  %v3550_v20 = vld [vmem:[%s4688_s1] sm:$0xff]  ;;  %vm247_vm1 = vcmask 293888   ;;  %v3579_v33 = vld [vmem:[%s4688_s1 + $0x8] sm:$0xff] }
   0xc   : > { %s3397_s20 = smul.u32 2560, %s4702_s19  ;;  %s3396_s15 = sshll.u32 %s4702_s19, 6 }
   0xd   : > { %s4630_s19 = scalar_lea.vmem %s4692_s5, %s3396_s15 }
   0xe   : > { %s3521_s23 = scalar_lea.vmem %s4687_s0, %s3397_s20 }
   0xf   : > { %v243_v0 = vld [vmem:[%s3521_s23 + $0x80] sm:$0xf]  ;;  %v244_v1 = vld [vmem:[%s3521_s23 + $0x88] sm:$0xf]  ;;  %v245_v2 = vld [vmem:[%s3521_s23 + $0x90] sm:$0xf] }
  0x10   : > { %2902 = vmatpush.msk.msra.mxu0 %vm254_vm0, %v243_v0  ;;  %2905 = vmatpush.msk.msra.mxu1 %vm254_vm0, %v244_v1  ;;  %v246_v3 = vld [vmem:[%s3521_s23 + $0x98] sm:$0xf]  ;;  %v239_v4 = vld [vmem:[%s3521_s23 + $0x60] sm:$0xff]  ;;  %v240_v5 = vld [vmem:[%s3521_s23 + $0x68] sm:$0xff] }
  0x11   : > { %2908 = vmatpush.msk.msra.mxu2 %vm254_vm0, %v245_v2  ;;  %2911 = vmatpush.msk.msra.mxu3 %vm254_vm0, %v246_v3  ;;  %v241_v6 = vld [vmem:[%s3521_s23 + $0x70] sm:$0xff]  ;;  %v242_v7 = vld [vmem:[%s3521_s23 + $0x78] sm:$0xff]  ;;  %v235_v8 = vld [vmem:[%s3521_s23 + $0x40] sm:$0xff] }
  0x12   : > { %279 = vmatpush.msra.mxu0 %v239_v4  ;;  %302 = vmatpush.msra.mxu1 %v240_v5  ;;  %v236_v9 = vld [vmem:[%s3521_s23 + $0x48] sm:$0xff]  ;;  %v237_v10 = vld [vmem:[%s3521_s23 + $0x50] sm:$0xff]  ;;  %v238_v11 = vld [vmem:[%s3521_s23 + $0x58] sm:$0xff] }
  0x13   : > { %325 = vmatpush.msra.mxu2 %v241_v6  ;;  %348 = vmatpush.msra.mxu3 %v242_v7  ;;  %v231_v12 = vld [vmem:[%s3521_s23 + $0x20] sm:$0xff]  ;;  %v232_v13 = vld [vmem:[%s3521_s23 + $0x28] sm:$0xff]  ;;  %v233_v14 = vld [vmem:[%s3521_s23 + $0x30] sm:$0xff] }
  0x14   : > { %280 = vmatpush.msra.mxu0 %v235_v8  ;;  %303 = vmatpush.msra.mxu1 %v236_v9  ;;  %v234_v15 = vld [vmem:[%s3521_s23 + $0x38] sm:$0xff]  ;;  %v227_v16 = vld [vmem:[%s3521_s23] sm:$0xff]  ;;  %v228_v17 = vld [vmem:[%s3521_s23 + $0x8] sm:$0xff] }
  0x15   : > { %326 = vmatpush.msra.mxu2 %v237_v10  ;;  %349 = vmatpush.msra.mxu3 %v238_v11  ;;  %v229_v18 = vld [vmem:[%s3521_s23 + $0x10] sm:$0xff]  ;;  %v230_v19 = vld [vmem:[%s3521_s23 + $0x18] sm:$0xff]  ;;  %v2930_v23 = vld [vmem:[%s3521_s23 + $0x120] sm:$0xf] }
  0x16   : > { %281 = vmatpush.msra.mxu0 %v231_v12  ;;  %304 = vmatpush.msra.mxu1 %v232_v13  ;;  %v2932_v21 = vld [vmem:[%s3521_s23 + $0x130] sm:$0xf]  ;;  %v2933_v22 = vld [vmem:[%s3521_s23 + $0x138] sm:$0xf]  ;;  %v2931_v24 = vld [vmem:[%s3521_s23 + $0x128] sm:$0xf] }
  0x17   : > { %327 = vmatpush.msra.mxu2 %v233_v14  ;;  %350 = vmatpush.msra.mxu3 %v234_v15  ;;  %v2928_v25 = vld [vmem:[%s3521_s23 + $0x110] sm:$0xff]  ;;  %v2929_v26 = vld [vmem:[%s3521_s23 + $0x118] sm:$0xff]  ;;  %v2926_v27 = vld [vmem:[%s3521_s23 + $0x100] sm:$0xff] }
  0x18   : > { %282 = vmatpush.msra.mxu0 %v227_v16  ;;  %305 = vmatpush.msra.mxu1 %v228_v17  ;;  %v2927_v28 = vld [vmem:[%s3521_s23 + $0x108] sm:$0xff]  ;;  %v2924_v29 = vld [vmem:[%s3521_s23 + $0xf0] sm:$0xff]  ;;  %v2925_v30 = vld [vmem:[%s3521_s23 + $0xf8] sm:$0xff] }
  0x19   : > { %328 = vmatpush.msra.mxu2 %v229_v18  ;;  %351 = vmatpush.msra.mxu3 %v230_v19  ;;  %v2922_v31 = vld [vmem:[%s3521_s23 + $0xe0] sm:$0xff]  ;;  %v2923_v32 = vld [vmem:[%s3521_s23 + $0xe8] sm:$0xff]  ;;  %v2920_v34 = vld [vmem:[%s3521_s23 + $0xd0] sm:$0xff] }
  0x1a   : > { %2903 = vmatmul.msk.f32.vlgmr.msra.gmra.mxu0 %vm247_vm1, %v3550_v20  ;;  %2906 = vmatmul.msk.f32.vlgmr.msra.gmra.mxu1 %vm247_vm1, %v3550_v20  ;;  %v2921_v35 = vld [vmem:[%s3521_s23 + $0xd8] sm:$0xff]  ;;  %v2918_v36 = vld [vmem:[%s3521_s23 + $0xc0] sm:$0xff]  ;;  %v2919_v37 = vld [vmem:[%s3521_s23 + $0xc8] sm:$0xff] }
  0x1b   : > { %2909 = vmatmul.msk.f32.vlgmr.msra.gmra.mxu2 %vm247_vm1, %v3550_v20  ;;  %2912 = vmatmul.msk.f32.vlgmr.msra.gmra.mxu3 %vm247_vm1, %v3550_v20  ;;  %v2916_v38 = vld [vmem:[%s3521_s23 + $0xb0] sm:$0xff]  ;;  %v2917_v39 = vld [vmem:[%s3521_s23 + $0xb8] sm:$0xff]  ;;  %v2914_v40 = vld [vmem:[%s3521_s23 + $0xa0] sm:$0xff] }
  0x1c   : > { %2940 = vmatpush.msk.msrb.mxu2 %vm254_vm0, %v2932_v21  ;;  %2943 = vmatpush.msk.msrb.mxu3 %vm254_vm0, %v2933_v22  ;;  %v2915_v41 = vld [vmem:[%s3521_s23 + $0xa8] sm:$0xff]  ;;  %v2964_v42 = vld [vmem:[%s3521_s23 + $0x1d0] sm:$0xf]  ;;  %v2965_v43 = vld [vmem:[%s3521_s23 + $0x1d8] sm:$0xf] }
  0x1d   : > { %2934 = vmatpush.msk.msrb.mxu0 %vm254_vm0, %v2930_v23  ;;  %2937 = vmatpush.msk.msrb.mxu1 %vm254_vm0, %v2931_v24  ;;  %v2962_v44 = vld [vmem:[%s3521_s23 + $0x1c0] sm:$0xf]  ;;  %v2963_v45 = vld [vmem:[%s3521_s23 + $0x1c8] sm:$0xf]  ;;  %v2960_v46 = vld [vmem:[%s3521_s23 + $0x1b0] sm:$0xff] }
  0x1e   : > { %450 = vmatpush.msrb.mxu2 %v2928_v25  ;;  %473 = vmatpush.msrb.mxu3 %v2929_v26  ;;  %v2961_v47 = vld [vmem:[%s3521_s23 + $0x1b8] sm:$0xff]  ;;  %v2958_v48 = vld [vmem:[%s3521_s23 + $0x1a0] sm:$0xff]  ;;  %v2959_v49 = vld [vmem:[%s3521_s23 + $0x1a8] sm:$0xff] }
  0x1f   : > { %404 = vmatpush.msrb.mxu0 %v2926_v27  ;;  %427 = vmatpush.msrb.mxu1 %v2927_v28  ;;  %v2956_v50 = vld [vmem:[%s3521_s23 + $0x190] sm:$0xff]  ;;  %v2957_v51 = vld [vmem:[%s3521_s23 + $0x198] sm:$0xff]  ;;  %v2954_v52 = vld [vmem:[%s3521_s23 + $0x180] sm:$0xff] }
  0x20   : > { %451 = vmatpush.msrb.mxu2 %v2924_v29  ;;  %474 = vmatpush.msrb.mxu3 %v2925_v30  ;;  %v2955_v53 = vld [vmem:[%s3521_s23 + $0x188] sm:$0xff]  ;;  %v2952_v54 = vld [vmem:[%s3521_s23 + $0x170] sm:$0xff]  ;;  %v2953_v55 = vld [vmem:[%s3521_s23 + $0x178] sm:$0xff] }
  0x21   : > { %405 = vmatpush.msrb.mxu0 %v2922_v31  ;;  %428 = vmatpush.msrb.mxu1 %v2923_v32  ;;  %v2950_v56 = vld [vmem:[%s3521_s23 + $0x160] sm:$0xff]  ;;  %v2951_v57 = vld [vmem:[%s3521_s23 + $0x168] sm:$0xff]  ;;  %v2948_v58 = vld [vmem:[%s3521_s23 + $0x150] sm:$0xff] }
  0x22   : > { %2904 = vmatmul.msk.f32.gmra.mxu0 %vm247_vm1, %v3579_v33  ;;  %2907 = vmatmul.msk.f32.gmra.mxu1 %vm247_vm1, %v3579_v33  ;;  %v2946_v59 = vld [vmem:[%s3521_s23 + $0x140] sm:$0xff]  ;;  %v2947_v60 = vld [vmem:[%s3521_s23 + $0x148] sm:$0xff]  ;;  %v2949_v61 = vld [vmem:[%s3521_s23 + $0x158] sm:$0xff] }
  0x23   : > { %2910 = vmatmul.msk.f32.gmra.mxu2 %vm247_vm1, %v3579_v33  ;;  %2913 = vmatmul.msk.f32.gmra.mxu3 %vm247_vm1, %v3579_v33  ;;  %v2996_v62 = vld [vmem:[%s3521_s23 + $0x270] sm:$0xf]  ;;  %v2997_v63 = vld [vmem:[%s3521_s23 + $0x278] sm:$0xf]  ;;  %v2994_v0 = vld [vmem:[%s3521_s23 + $0x260] sm:$0xf] }
  0x24   : > { %452 = vmatpush.msrb.mxu2 %v2920_v34  ;;  %475 = vmatpush.msrb.mxu3 %v2921_v35  ;;  %v2995_v1 = vld [vmem:[%s3521_s23 + $0x268] sm:$0xf]  ;;  %v2992_v2 = vld [vmem:[%s3521_s23 + $0x250] sm:$0xff]  ;;  %v2993_v3 = vld [vmem:[%s3521_s23 + $0x258] sm:$0xff] }
  0x25   : > { %406 = vmatpush.msrb.mxu0 %v2918_v36  ;;  %429 = vmatpush.msrb.mxu1 %v2919_v37  ;;  %v2990_v4 = vld [vmem:[%s3521_s23 + $0x240] sm:$0xff]  ;;  %v2991_v5 = vld [vmem:[%s3521_s23 + $0x248] sm:$0xff]  ;;  %v2988_v6 = vld [vmem:[%s3521_s23 + $0x230] sm:$0xff] }
  0x26   : > { %453 = vmatpush.msrb.mxu2 %v2916_v38  ;;  %476 = vmatpush.msrb.mxu3 %v2917_v39  ;;  %v2989_v7 = vld [vmem:[%s3521_s23 + $0x238] sm:$0xff]  ;;  %v2986_v8 = vld [vmem:[%s3521_s23 + $0x220] sm:$0xff]  ;;  %v2987_v9 = vld [vmem:[%s3521_s23 + $0x228] sm:$0xff] }
  0x27   : > { %407 = vmatpush.msrb.mxu0 %v2914_v40  ;;  %430 = vmatpush.msrb.mxu1 %v2915_v41  ;;  %v2984_v10 = vld [vmem:[%s3521_s23 + $0x210] sm:$0xff]  ;;  %v2985_v11 = vld [vmem:[%s3521_s23 + $0x218] sm:$0xff]  ;;  %v2982_v12 = vld [vmem:[%s3521_s23 + $0x200] sm:$0xff] }
  0x28   : > { %2972 = vmatpush.msk.msra.mxu2 %vm254_vm0, %v2964_v42  ;;  %2975 = vmatpush.msk.msra.mxu3 %vm254_vm0, %v2965_v43  ;;  %v2983_v13 = vld [vmem:[%s3521_s23 + $0x208] sm:$0xff]  ;;  %v2980_v14 = vld [vmem:[%s3521_s23 + $0x1f0] sm:$0xff]  ;;  %v2981_v15 = vld [vmem:[%s3521_s23 + $0x1f8] sm:$0xff] }
  0x29   : > { %2966 = vmatpush.msk.msra.mxu0 %vm254_vm0, %v2962_v44  ;;  %2969 = vmatpush.msk.msra.mxu1 %vm254_vm0, %v2963_v45  ;;  %v2978_v16 = vld [vmem:[%s3521_s23 + $0x1e0] sm:$0xff]  ;;  %v2979_v17 = vld [vmem:[%s3521_s23 + $0x1e8] sm:$0xff]  ;;  %v3028_v18 = vld [vmem:[%s3521_s23 + $0x310] sm:$0xf] }
  0x2a   : > { %2935 = vmatmul.msk.f32.vlgmr.msrb.gmra.mxu0 %vm247_vm1, %v3550_v20  ;;  %2938 = vmatmul.msk.f32.vlgmr.msrb.gmra.mxu1 %vm247_vm1, %v3550_v20  ;;  %v3029_v19 = vld [vmem:[%s3521_s23 + $0x318] sm:$0xf]  ;;  %v3026_v21 = vld [vmem:[%s3521_s23 + $0x300] sm:$0xf]  ;;  %v3027_v22 = vld [vmem:[%s3521_s23 + $0x308] sm:$0xf] }
  0x2b   : > { %2941 = vmatmul.msk.f32.vlgmr.msrb.gmra.mxu2 %vm247_vm1, %v3550_v20  ;;  %2944 = vmatmul.msk.f32.vlgmr.msrb.gmra.mxu3 %vm247_vm1, %v3550_v20  ;;  %v3024_v23 = vld [vmem:[%s3521_s23 + $0x2f0] sm:$0xff]  ;;  %v3025_v24 = vld [vmem:[%s3521_s23 + $0x2f8] sm:$0xff]  ;;  %v3022_v25 = vld [vmem:[%s3521_s23 + $0x2e0] sm:$0xff] }
  0x2c   : > { %583 = vmatpush.msra.mxu2 %v2960_v46  ;;  %606 = vmatpush.msra.mxu3 %v2961_v47  ;;  %v3023_v26 = vld [vmem:[%s3521_s23 + $0x2e8] sm:$0xff]  ;;  %v3020_v27 = vld [vmem:[%s3521_s23 + $0x2d0] sm:$0xff]  ;;  %v3021_v28 = vld [vmem:[%s3521_s23 + $0x2d8] sm:$0xff] }
  0x2d   : > { %537 = vmatpush.msra.mxu0 %v2958_v48  ;;  %560 = vmatpush.msra.mxu1 %v2959_v49  ;;  %v3018_v29 = vld [vmem:[%s3521_s23 + $0x2c0] sm:$0xff]  ;;  %v3019_v30 = vld [vmem:[%s3521_s23 + $0x2c8] sm:$0xff]  ;;  %v3016_v31 = vld [vmem:[%s3521_s23 + $0x2b0] sm:$0xff] }
  0x2e   : > { %584 = vmatpush.msra.mxu2 %v2956_v50  ;;  %607 = vmatpush.msra.mxu3 %v2957_v51  ;;  %v3017_v32 = vld [vmem:[%s3521_s23 + $0x2b8] sm:$0xff]  ;;  %v3014_v34 = vld [vmem:[%s3521_s23 + $0x2a0] sm:$0xff]  ;;  %v3015_v35 = vld [vmem:[%s3521_s23 + $0x2a8] sm:$0xff] }
  0x2f   : > { %538 = vmatpush.msra.mxu0 %v2954_v52  ;;  %561 = vmatpush.msra.mxu1 %v2955_v53  ;;  %v3012_v36 = vld [vmem:[%s3521_s23 + $0x290] sm:$0xff]  ;;  %v3013_v37 = vld [vmem:[%s3521_s23 + $0x298] sm:$0xff]  ;;  %v3010_v38 = vld [vmem:[%s3521_s23 + $0x280] sm:$0xff] }
  0x30   : > { %585 = vmatpush.msra.mxu2 %v2952_v54  ;;  %608 = vmatpush.msra.mxu3 %v2953_v55  ;;  %v3011_v39 = vld [vmem:[%s3521_s23 + $0x288] sm:$0xff]  ;;  %v3060_v40 = vld [vmem:[%s3521_s23 + $0x3b0] sm:$0xf]  ;;  %v3061_v41 = vld [vmem:[%s3521_s23 + $0x3b8] sm:$0xf] }
  0x31   : > { %539 = vmatpush.msra.mxu0 %v2950_v56  ;;  %562 = vmatpush.msra.mxu1 %v2951_v57  ;;  %v3058_v42 = vld [vmem:[%s3521_s23 + $0x3a0] sm:$0xf]  ;;  %v3059_v43 = vld [vmem:[%s3521_s23 + $0x3a8] sm:$0xf]  ;;  %v3056_v44 = vld [vmem:[%s3521_s23 + $0x390] sm:$0xff] }
  0x32   : > { %2936 = vmatmul.msk.f32.gmra.mxu0 %vm247_vm1, %v3579_v33  ;;  %2939 = vmatmul.msk.f32.gmra.mxu1 %vm247_vm1, %v3579_v33  ;;  %v3057_v45 = vld [vmem:[%s3521_s23 + $0x398] sm:$0xff]  ;;  %v3054_v46 = vld [vmem:[%s3521_s23 + $0x380] sm:$0xff]  ;;  %v3055_v47 = vld [vmem:[%s3521_s23 + $0x388] sm:$0xff] }
  0x33   : > { %2942 = vmatmul.msk.f32.gmra.mxu2 %vm247_vm1, %v3579_v33  ;;  %2945 = vmatmul.msk.f32.gmra.mxu3 %vm247_vm1, %v3579_v33  ;;  %v3052_v48 = vld [vmem:[%s3521_s23 + $0x370] sm:$0xff]  ;;  %v3053_v49 = vld [vmem:[%s3521_s23 + $0x378] sm:$0xff]  ;;  %v3050_v50 = vld [vmem:[%s3521_s23 + $0x360] sm:$0xff] }
  0x34   : > { %586 = vmatpush.msra.mxu2 %v2948_v58  ;;  %540 = vmatpush.msra.mxu0 %v2946_v59  ;;  %v3051_v51 = vld [vmem:[%s3521_s23 + $0x368] sm:$0xff]  ;;  %v3048_v52 = vld [vmem:[%s3521_s23 + $0x350] sm:$0xff]  ;;  %v3049_v53 = vld [vmem:[%s3521_s23 + $0x358] sm:$0xff] }
  0x35   : > { %563 = vmatpush.msra.mxu1 %v2947_v60  ;;  %609 = vmatpush.msra.mxu3 %v2949_v61  ;;  %v3046_v54 = vld [vmem:[%s3521_s23 + $0x340] sm:$0xff]  ;;  %v3047_v55 = vld [vmem:[%s3521_s23 + $0x348] sm:$0xff]  ;;  %v3044_v56 = vld [vmem:[%s3521_s23 + $0x330] sm:$0xff] }
  0x36   : > { %3004 = vmatpush.msk.msrb.mxu2 %vm254_vm0, %v2996_v62  ;;  %2998 = vmatpush.msk.msrb.mxu0 %vm254_vm0, %v2994_v0  ;;  %v3042_v57 = vld [vmem:[%s3521_s23 + $0x320] sm:$0xff]  ;;  %v3043_v58 = vld [vmem:[%s3521_s23 + $0x328] sm:$0xff]  ;;  %v3045_v59 = vld [vmem:[%s3521_s23 + $0x338] sm:$0xff] }
  0x37   : > { %3007 = vmatpush.msk.msrb.mxu3 %vm254_vm0, %v2997_v63  ;;  %3001 = vmatpush.msk.msrb.mxu1 %vm254_vm0, %v2995_v1  ;;  %v3092_v60 = vld [vmem:[%s3521_s23 + $0x450] sm:$0xf]  ;;  %v3093_v61 = vld [vmem:[%s3521_s23 + $0x458] sm:$0xf]  ;;  %v3090_v62 = vld [vmem:[%s3521_s23 + $0x440] sm:$0xf] }
  0x38   : > { %716 = vmatpush.msrb.mxu2 %v2992_v2  ;;  %670 = vmatpush.msrb.mxu0 %v2990_v4  ;;  %v3091_v63 = vld [vmem:[%s3521_s23 + $0x448] sm:$0xf]  ;;  %v3088_v0 = vld [vmem:[%s3521_s23 + $0x430] sm:$0xff]  ;;  %v3089_v1 = vld [vmem:[%s3521_s23 + $0x438] sm:$0xff] }
  0x39   : > { %739 = vmatpush.msrb.mxu3 %v2993_v3  ;;  %693 = vmatpush.msrb.mxu1 %v2991_v5  ;;  %v3086_v2 = vld [vmem:[%s3521_s23 + $0x420] sm:$0xff]  ;;  %v3087_v3 = vld [vmem:[%s3521_s23 + $0x428] sm:$0xff]  ;;  %v3084_v4 = vld [vmem:[%s3521_s23 + $0x410] sm:$0xff] }
  0x3a   : > { %2967 = vmatmul.msk.f32.vlgmr.msra.gmra.mxu0 %vm247_vm1, %v3550_v20  ;;  %2970 = vmatmul.msk.f32.vlgmr.msra.gmra.mxu1 %vm247_vm1, %v3550_v20  ;;  %v3085_v5 = vld [vmem:[%s3521_s23 + $0x418] sm:$0xff] }
  0x3b   : > { %2973 = vmatmul.msk.f32.vlgmr.msra.gmra.mxu2 %vm247_vm1, %v3550_v20  ;;  %2976 = vmatmul.msk.f32.vlgmr.msra.gmra.mxu3 %vm247_vm1, %v3550_v20 }
  0x3c   : > { %717 = vmatpush.msrb.mxu2 %v2988_v6  ;;  %740 = vmatpush.msrb.mxu3 %v2989_v7  ;;  %v3082_v6 = vld [vmem:[%s3521_s23 + $0x400] sm:$0xff]  ;;  %v3083_v7 = vld [vmem:[%s3521_s23 + $0x408] sm:$0xff] }
  0x3d   : > { %671 = vmatpush.msrb.mxu0 %v2986_v8  ;;  %694 = vmatpush.msrb.mxu1 %v2987_v9  ;;  %v3080_v8 = vld [vmem:[%s3521_s23 + $0x3f0] sm:$0xff]  ;;  %v3081_v9 = vld [vmem:[%s3521_s23 + $0x3f8] sm:$0xff] }
  0x3e   : > { %718 = vmatpush.msrb.mxu2 %v2984_v10  ;;  %741 = vmatpush.msrb.mxu3 %v2985_v11  ;;  %v3078_v10 = vld [vmem:[%s3521_s23 + $0x3e0] sm:$0xff]  ;;  %v3079_v11 = vld [vmem:[%s3521_s23 + $0x3e8] sm:$0xff] }
  0x3f   : > { %672 = vmatpush.msrb.mxu0 %v2982_v12  ;;  %695 = vmatpush.msrb.mxu1 %v2983_v13  ;;  %v3076_v12 = vld [vmem:[%s3521_s23 + $0x3d0] sm:$0xff]  ;;  %v3077_v13 = vld [vmem:[%s3521_s23 + $0x3d8] sm:$0xff] }
  0x40   : > { %719 = vmatpush.msrb.mxu2 %v2980_v14  ;;  %742 = vmatpush.msrb.mxu3 %v2981_v15  ;;  %v3074_v14 = vld [vmem:[%s3521_s23 + $0x3c0] sm:$0xff]  ;;  %v3075_v15 = vld [vmem:[%s3521_s23 + $0x3c8] sm:$0xff] }
  0x41   : > { %673 = vmatpush.msrb.mxu0 %v2978_v16  ;;  %696 = vmatpush.msrb.mxu1 %v2979_v17  ;;  %v3124_v16 = vld [vmem:[%s3521_s23 + $0x4f0] sm:$0xf]  ;;  %v3125_v17 = vld [vmem:[%s3521_s23 + $0x4f8] sm:$0xf] }
  0x42   : > { %2968 = vmatmul.msk.f32.gmra.mxu0 %vm247_vm1, %v3579_v33  ;;  %2971 = vmatmul.msk.f32.gmra.mxu1 %vm247_vm1, %v3579_v33 }
  0x43   : > { %2974 = vmatmul.msk.f32.gmra.mxu2 %vm247_vm1, %v3579_v33  ;;  %2977 = vmatmul.msk.f32.gmra.mxu3 %vm247_vm1, %v3579_v33 }
  0x44   : > { %3036 = vmatpush.msk.msra.mxu2 %vm254_vm0, %v3028_v18  ;;  %3039 = vmatpush.msk.msra.mxu3 %vm254_vm0, %v3029_v19  ;;  %v3122_v18 = vld [vmem:[%s3521_s23 + $0x4e0] sm:$0xf]  ;;  %v3123_v19 = vld [vmem:[%s3521_s23 + $0x4e8] sm:$0xf] }
  0x45   : > { %3030 = vmatpush.msk.msra.mxu0 %vm254_vm0, %v3026_v21  ;;  %3033 = vmatpush.msk.msra.mxu1 %vm254_vm0, %v3027_v22  ;;  %v3120_v21 = vld [vmem:[%s3521_s23 + $0x4d0] sm:$0xff]  ;;  %v3121_v22 = vld [vmem:[%s3521_s23 + $0x4d8] sm:$0xff] }
  0x46   : > { %849 = vmatpush.msra.mxu2 %v3024_v23  ;;  %872 = vmatpush.msra.mxu3 %v3025_v24  ;;  %v3118_v23 = vld [vmem:[%s3521_s23 + $0x4c0] sm:$0xff]  ;;  %v3119_v24 = vld [vmem:[%s3521_s23 + $0x4c8] sm:$0xff] }
  0x47   : > { %803 = vmatpush.msra.mxu0 %v3022_v25  ;;  %826 = vmatpush.msra.mxu1 %v3023_v26  ;;  %v3116_v25 = vld [vmem:[%s3521_s23 + $0x4b0] sm:$0xff]  ;;  %v3117_v26 = vld [vmem:[%s3521_s23 + $0x4b8] sm:$0xff] }
  0x48   : > { %850 = vmatpush.msra.mxu2 %v3020_v27  ;;  %873 = vmatpush.msra.mxu3 %v3021_v28  ;;  %v3114_v27 = vld [vmem:[%s3521_s23 + $0x4a0] sm:$0xff]  ;;  %v3115_v28 = vld [vmem:[%s3521_s23 + $0x4a8] sm:$0xff] }
  0x49   : > { %804 = vmatpush.msra.mxu0 %v3018_v29  ;;  %827 = vmatpush.msra.mxu1 %v3019_v30  ;;  %v3112_v29 = vld [vmem:[%s3521_s23 + $0x490] sm:$0xff]  ;;  %v3113_v30 = vld [vmem:[%s3521_s23 + $0x498] sm:$0xff] }
  0x4a   : > { %2999 = vmatmul.msk.f32.vlgmr.msrb.gmra.mxu0 %vm247_vm1, %v3550_v20  ;;  %3002 = vmatmul.msk.f32.vlgmr.msrb.gmra.mxu1 %vm247_vm1, %v3550_v20 }
  0x4b   : > { %3005 = vmatmul.msk.f32.vlgmr.msrb.gmra.mxu2 %vm247_vm1, %v3550_v20  ;;  %3008 = vmatmul.msk.f32.vlgmr.msrb.gmra.mxu3 %vm247_vm1, %v3550_v20 }
  0x4c   : > { %851 = vmatpush.msra.mxu2 %v3016_v31  ;;  %874 = vmatpush.msra.mxu3 %v3017_v32  ;;  %v3110_v31 = vld [vmem:[%s3521_s23 + $0x480] sm:$0xff]  ;;  %v3111_v32 = vld [vmem:[%s3521_s23 + $0x488] sm:$0xff] }
  0x4d   : > { %805 = vmatpush.msra.mxu0 %v3014_v34  ;;  %828 = vmatpush.msra.mxu1 %v3015_v35  ;;  %v3108_v34 = vld [vmem:[%s3521_s23 + $0x470] sm:$0xff]  ;;  %v3109_v35 = vld [vmem:[%s3521_s23 + $0x478] sm:$0xff] }
  0x4e   : > { %852 = vmatpush.msra.mxu2 %v3012_v36  ;;  %875 = vmatpush.msra.mxu3 %v3013_v37  ;;  %v3106_v36 = vld [vmem:[%s3521_s23 + $0x460] sm:$0xff]  ;;  %v3107_v37 = vld [vmem:[%s3521_s23 + $0x468] sm:$0xff] }
  0x4f   : > { %806 = vmatpush.msra.mxu0 %v3010_v38  ;;  %829 = vmatpush.msra.mxu1 %v3011_v39  ;;  %v3156_v38 = vld [vmem:[%s3521_s23 + $0x590] sm:$0xf]  ;;  %v3157_v39 = vld [vmem:[%s3521_s23 + $0x598] sm:$0xf] }
  0x50   : > { %3068 = vmatpush.msk.msrb.mxu2 %vm254_vm0, %v3060_v40  ;;  %3071 = vmatpush.msk.msrb.mxu3 %vm254_vm0, %v3061_v41  ;;  %v3154_v40 = vld [vmem:[%s3521_s23 + $0x580] sm:$0xf]  ;;  %v3155_v41 = vld [vmem:[%s3521_s23 + $0x588] sm:$0xf] }
  0x51   : > { %3062 = vmatpush.msk.msrb.mxu0 %vm254_vm0, %v3058_v42  ;;  %3065 = vmatpush.msk.msrb.mxu1 %vm254_vm0, %v3059_v43  ;;  %v3152_v42 = vld [vmem:[%s3521_s23 + $0x570] sm:$0xff]  ;;  %v3153_v43 = vld [vmem:[%s3521_s23 + $0x578] sm:$0xff] }
  0x52   : > { %3000 = vmatmul.msk.f32.gmra.mxu0 %vm247_vm1, %v3579_v33  ;;  %3003 = vmatmul.msk.f32.gmra.mxu1 %vm247_vm1, %v3579_v33 }
  0x53   : > { %3006 = vmatmul.msk.f32.gmra.mxu2 %vm247_vm1, %v3579_v33  ;;  %3009 = vmatmul.msk.f32.gmra.mxu3 %vm247_vm1, %v3579_v33 }
  0x54   : > { %982 = vmatpush.msrb.mxu2 %v3056_v44  ;;  %1005 = vmatpush.msrb.mxu3 %v3057_v45  ;;  %v3150_v44 = vld [vmem:[%s3521_s23 + $0x560] sm:$0xff]  ;;  %v3151_v45 = vld [vmem:[%s3521_s23 + $0x568] sm:$0xff] }
  0x55   : > { %936 = vmatpush.msrb.mxu0 %v3054_v46  ;;  %959 = vmatpush.msrb.mxu1 %v3055_v47  ;;  %v3148_v46 = vld [vmem:[%s3521_s23 + $0x550] sm:$0xff]  ;;  %v3149_v47 = vld [vmem:[%s3521_s23 + $0x558] sm:$0xff] }
  0x56   : > { %983 = vmatpush.msrb.mxu2 %v3052_v48  ;;  %1006 = vmatpush.msrb.mxu3 %v3053_v49  ;;  %v3146_v48 = vld [vmem:[%s3521_s23 + $0x540] sm:$0xff]  ;;  %v3147_v49 = vld [vmem:[%s3521_s23 + $0x548] sm:$0xff] }
  0x57   : > { %937 = vmatpush.msrb.mxu0 %v3050_v50  ;;  %960 = vmatpush.msrb.mxu1 %v3051_v51  ;;  %v3144_v50 = vld [vmem:[%s3521_s23 + $0x530] sm:$0xff]  ;;  %v3145_v51 = vld [vmem:[%s3521_s23 + $0x538] sm:$0xff] }
  0x58   : > { %984 = vmatpush.msrb.mxu2 %v3048_v52  ;;  %1007 = vmatpush.msrb.mxu3 %v3049_v53  ;;  %v3142_v52 = vld [vmem:[%s3521_s23 + $0x520] sm:$0xff]  ;;  %v3143_v53 = vld [vmem:[%s3521_s23 + $0x528] sm:$0xff] }
  0x59   : > { %938 = vmatpush.msrb.mxu0 %v3046_v54  ;;  %961 = vmatpush.msrb.mxu1 %v3047_v55  ;;  %v3140_v54 = vld [vmem:[%s3521_s23 + $0x510] sm:$0xff]  ;;  %v3141_v55 = vld [vmem:[%s3521_s23 + $0x518] sm:$0xff] }
  0x5a   : > { %3031 = vmatmul.msk.f32.vlgmr.msra.gmra.mxu0 %vm247_vm1, %v3550_v20  ;;  %3034 = vmatmul.msk.f32.vlgmr.msra.gmra.mxu1 %vm247_vm1, %v3550_v20 }
  0x5b   : > { %3037 = vmatmul.msk.f32.vlgmr.msra.gmra.mxu2 %vm247_vm1, %v3550_v20  ;;  %3040 = vmatmul.msk.f32.vlgmr.msra.gmra.mxu3 %vm247_vm1, %v3550_v20 }
  0x5c   : > { %985 = vmatpush.msrb.mxu2 %v3044_v56  ;;  %939 = vmatpush.msrb.mxu0 %v3042_v57  ;;  %v3138_v56 = vld [vmem:[%s3521_s23 + $0x500] sm:$0xff]  ;;  %v3139_v57 = vld [vmem:[%s3521_s23 + $0x508] sm:$0xff] }
  0x5d   : > { %962 = vmatpush.msrb.mxu1 %v3043_v58  ;;  %1008 = vmatpush.msrb.mxu3 %v3045_v59  ;;  %v3188_v58 = vld [vmem:[%s3521_s23 + $0x630] sm:$0xf]  ;;  %v3189_v59 = vld [vmem:[%s3521_s23 + $0x638] sm:$0xf] }
  0x5e   : > { %3100 = vmatpush.msk.msra.mxu2 %vm254_vm0, %v3092_v60  ;;  %3094 = vmatpush.msk.msra.mxu0 %vm254_vm0, %v3090_v62  ;;  %v3186_v60 = vld [vmem:[%s3521_s23 + $0x620] sm:$0xf]  ;;  %v3184_v62 = vld [vmem:[%s3521_s23 + $0x610] sm:$0xff] }
  0x5f   : > { %3103 = vmatpush.msk.msra.mxu3 %vm254_vm0, %v3093_v61  ;;  %3097 = vmatpush.msk.msra.mxu1 %vm254_vm0, %v3091_v63  ;;  %v3187_v61 = vld [vmem:[%s3521_s23 + $0x628] sm:$0xf]  ;;  %v3185_v63 = vld [vmem:[%s3521_s23 + $0x618] sm:$0xff] }
  0x60   : > { %1115 = vmatpush.msra.mxu2 %v3088_v0  ;;  %1069 = vmatpush.msra.mxu0 %v3086_v2  ;;  %v3182_v0 = vld [vmem:[%s3521_s23 + $0x600] sm:$0xff]  ;;  %v3180_v2 = vld [vmem:[%s3521_s23 + $0x5f0] sm:$0xff] }
  0x61   : > { %1138 = vmatpush.msra.mxu3 %v3089_v1  ;;  %1092 = vmatpush.msra.mxu1 %v3087_v3  ;;  %v3183_v1 = vld [vmem:[%s3521_s23 + $0x608] sm:$0xff]  ;;  %v3181_v3 = vld [vmem:[%s3521_s23 + $0x5f8] sm:$0xff] }
  0x62   : > { %3032 = vmatmul.msk.f32.gmra.mxu0 %vm247_vm1, %v3579_v33  ;;  %3035 = vmatmul.msk.f32.gmra.mxu1 %vm247_vm1, %v3579_v33 }
  0x63   : > { %3038 = vmatmul.msk.f32.gmra.mxu2 %vm247_vm1, %v3579_v33  ;;  %3041 = vmatmul.msk.f32.gmra.mxu3 %vm247_vm1, %v3579_v33 }
  0x64   : > { %1116 = vmatpush.msra.mxu2 %v3084_v4  ;;  %1139 = vmatpush.msra.mxu3 %v3085_v5  ;;  %v3178_v4 = vld [vmem:[%s3521_s23 + $0x5e0] sm:$0xff]  ;;  %v3179_v5 = vld [vmem:[%s3521_s23 + $0x5e8] sm:$0xff] }
  0x65   : > { %1070 = vmatpush.msra.mxu0 %v3082_v6  ;;  %1093 = vmatpush.msra.mxu1 %v3083_v7  ;;  %v3176_v6 = vld [vmem:[%s3521_s23 + $0x5d0] sm:$0xff]  ;;  %v3177_v7 = vld [vmem:[%s3521_s23 + $0x5d8] sm:$0xff] }
  0x66   : > { %1117 = vmatpush.msra.mxu2 %v3080_v8  ;;  %1140 = vmatpush.msra.mxu3 %v3081_v9  ;;  %v3174_v8 = vld [vmem:[%s3521_s23 + $0x5c0] sm:$0xff]  ;;  %v3175_v9 = vld [vmem:[%s3521_s23 + $0x5c8] sm:$0xff] }
  0x67   : > { %1071 = vmatpush.msra.mxu0 %v3078_v10  ;;  %1094 = vmatpush.msra.mxu1 %v3079_v11  ;;  %v3172_v10 = vld [vmem:[%s3521_s23 + $0x5b0] sm:$0xff]  ;;  %v3173_v11 = vld [vmem:[%s3521_s23 + $0x5b8] sm:$0xff] }
  0x68   : > { %1118 = vmatpush.msra.mxu2 %v3076_v12  ;;  %1141 = vmatpush.msra.mxu3 %v3077_v13  ;;  %v3170_v12 = vld [vmem:[%s3521_s23 + $0x5a0] sm:$0xff]  ;;  %v3171_v13 = vld [vmem:[%s3521_s23 + $0x5a8] sm:$0xff] }
  0x69   : > { %1072 = vmatpush.msra.mxu0 %v3074_v14  ;;  %1095 = vmatpush.msra.mxu1 %v3075_v15 }
  0x6a   : > { %3063 = vmatmul.msk.f32.vlgmr.msrb.gmra.mxu0 %vm247_vm1, %v3550_v20  ;;  %3066 = vmatmul.msk.f32.vlgmr.msrb.gmra.mxu1 %vm247_vm1, %v3550_v20 }
  0x6b   : > { %3069 = vmatmul.msk.f32.vlgmr.msrb.gmra.mxu2 %vm247_vm1, %v3550_v20  ;;  %3072 = vmatmul.msk.f32.vlgmr.msrb.gmra.mxu3 %vm247_vm1, %v3550_v20 }
  0x6c   : > { %3132 = vmatpush.msk.msrb.mxu2 %vm254_vm0, %v3124_v16  ;;  %3135 = vmatpush.msk.msrb.mxu3 %vm254_vm0, %v3125_v17  ;;  %v3220_v16 = vld [vmem:[%s3521_s23 + $0x6d0] sm:$0xf]  ;;  %v3221_v17 = vld [vmem:[%s3521_s23 + $0x6d8] sm:$0xf] }
  0x6d   : > { %3126 = vmatpush.msk.msrb.mxu0 %vm254_vm0, %v3122_v18  ;;  %3129 = vmatpush.msk.msrb.mxu1 %vm254_vm0, %v3123_v19  ;;  %v3218_v18 = vld [vmem:[%s3521_s23 + $0x6c0] sm:$0xf]  ;;  %v3219_v19 = vld [vmem:[%s3521_s23 + $0x6c8] sm:$0xf] }
  0x6e   : > { %1248 = vmatpush.msrb.mxu2 %v3120_v21  ;;  %1271 = vmatpush.msrb.mxu3 %v3121_v22  ;;  %v3216_v21 = vld [vmem:[%s3521_s23 + $0x6b0] sm:$0xff]  ;;  %v3217_v22 = vld [vmem:[%s3521_s23 + $0x6b8] sm:$0xff] }
  0x6f   : > { %1202 = vmatpush.msrb.mxu0 %v3118_v23  ;;  %1225 = vmatpush.msrb.mxu1 %v3119_v24  ;;  %v3214_v23 = vld [vmem:[%s3521_s23 + $0x6a0] sm:$0xff]  ;;  %v3215_v24 = vld [vmem:[%s3521_s23 + $0x6a8] sm:$0xff] }
  0x70   : > { %1249 = vmatpush.msrb.mxu2 %v3116_v25  ;;  %1272 = vmatpush.msrb.mxu3 %v3117_v26  ;;  %v3212_v25 = vld [vmem:[%s3521_s23 + $0x690] sm:$0xff]  ;;  %v3213_v26 = vld [vmem:[%s3521_s23 + $0x698] sm:$0xff] }
  0x71   : > { %1203 = vmatpush.msrb.mxu0 %v3114_v27  ;;  %1226 = vmatpush.msrb.mxu1 %v3115_v28 }
  0x72   : > { %3064 = vmatmul.msk.f32.gmra.mxu0 %vm247_vm1, %v3579_v33  ;;  %3067 = vmatmul.msk.f32.gmra.mxu1 %vm247_vm1, %v3579_v33 }
  0x73   : > { %3070 = vmatmul.msk.f32.gmra.mxu2 %vm247_vm1, %v3579_v33  ;;  %3073 = vmatmul.msk.f32.gmra.mxu3 %vm247_vm1, %v3579_v33 }
  0x74   : > { %1250 = vmatpush.msrb.mxu2 %v3112_v29  ;;  %1273 = vmatpush.msrb.mxu3 %v3113_v30  ;;  %v3210_v29 = vld [vmem:[%s3521_s23 + $0x680] sm:$0xff]  ;;  %v3211_v30 = vld [vmem:[%s3521_s23 + $0x688] sm:$0xff] }
  0x75   : > { %1204 = vmatpush.msrb.mxu0 %v3110_v31  ;;  %1227 = vmatpush.msrb.mxu1 %v3111_v32 }
  0x76   : > { %1251 = vmatpush.msrb.mxu2 %v3108_v34  ;;  %1274 = vmatpush.msrb.mxu3 %v3109_v35  ;;  %v3208_v34 = vld [vmem:[%s3521_s23 + $0x670] sm:$0xff]  ;;  %v3209_v35 = vld [vmem:[%s3521_s23 + $0x678] sm:$0xff] }
  0x77   : > { %1205 = vmatpush.msrb.mxu0 %v3106_v36  ;;  %1228 = vmatpush.msrb.mxu1 %v3107_v37  ;;  %v3206_v36 = vld [vmem:[%s3521_s23 + $0x660] sm:$0xff]  ;;  %v3207_v37 = vld [vmem:[%s3521_s23 + $0x668] sm:$0xff] }
  0x7a   : > { %3095 = vmatmul.msk.f32.vlgmr.msra.gmra.mxu0 %vm247_vm1, %v3550_v20  ;;  %3098 = vmatmul.msk.f32.vlgmr.msra.gmra.mxu1 %vm247_vm1, %v3550_v20 }
  0x7b   : > { %3101 = vmatmul.msk.f32.vlgmr.msra.gmra.mxu2 %vm247_vm1, %v3550_v20  ;;  %3104 = vmatmul.msk.f32.vlgmr.msra.gmra.mxu3 %vm247_vm1, %v3550_v20 }
  0x7c   : > { %3164 = vmatpush.msk.msra.mxu2 %vm254_vm0, %v3156_v38  ;;  %3167 = vmatpush.msk.msra.mxu3 %vm254_vm0, %v3157_v39  ;;  %v3204_v38 = vld [vmem:[%s3521_s23 + $0x650] sm:$0xff]  ;;  %v3205_v39 = vld [vmem:[%s3521_s23 + $0x658] sm:$0xff] }
  0x7d   : > { %3158 = vmatpush.msk.msra.mxu0 %vm254_vm0, %v3154_v40  ;;  %3161 = vmatpush.msk.msra.mxu1 %vm254_vm0, %v3155_v41  ;;  %v3202_v40 = vld [vmem:[%s3521_s23 + $0x640] sm:$0xff]  ;;  %v3203_v41 = vld [vmem:[%s3521_s23 + $0x648] sm:$0xff] }
  0x7e   : > { %1381 = vmatpush.msra.mxu2 %v3152_v42  ;;  %1404 = vmatpush.msra.mxu3 %v3153_v43 }
  0x7f   : > { %1335 = vmatpush.msra.mxu0 %v3150_v44  ;;  %1358 = vmatpush.msra.mxu1 %v3151_v45 }
  0x80   : > { %1382 = vmatpush.msra.mxu2 %v3148_v46  ;;  %1405 = vmatpush.msra.mxu3 %v3149_v47  ;;  %v3252_v46 = vld [vmem:[%s3521_s23 + $0x770] sm:$0xf]  ;;  %v3253_v47 = vld [vmem:[%s3521_s23 + $0x778] sm:$0xf] }
  0x81   : > { %1336 = vmatpush.msra.mxu0 %v3146_v48  ;;  %1359 = vmatpush.msra.mxu1 %v3147_v49  ;;  %v3250_v48 = vld [vmem:[%s3521_s23 + $0x760] sm:$0xf]  ;;  %v3251_v49 = vld [vmem:[%s3521_s23 + $0x768] sm:$0xf] }
  0x82   : > { %3096 = vmatmul.msk.f32.gmra.mxu0 %vm247_vm1, %v3579_v33  ;;  %3099 = vmatmul.msk.f32.gmra.mxu1 %vm247_vm1, %v3579_v33 }
  0x83   : > { %3102 = vmatmul.msk.f32.gmra.mxu2 %vm247_vm1, %v3579_v33  ;;  %3105 = vmatmul.msk.f32.gmra.mxu3 %vm247_vm1, %v3579_v33 }
  0x84   : > { %1383 = vmatpush.msra.mxu2 %v3144_v50  ;;  %1406 = vmatpush.msra.mxu3 %v3145_v51  ;;  %v3248_v50 = vld [vmem:[%s3521_s23 + $0x750] sm:$0xff]  ;;  %v3249_v51 = vld [vmem:[%s3521_s23 + $0x758] sm:$0xff] }
  0x85   : > { %1337 = vmatpush.msra.mxu0 %v3142_v52  ;;  %1360 = vmatpush.msra.mxu1 %v3143_v53  ;;  %v3246_v52 = vld [vmem:[%s3521_s23 + $0x740] sm:$0xff]  ;;  %v3247_v53 = vld [vmem:[%s3521_s23 + $0x748] sm:$0xff] }
  0x86   : > { %1384 = vmatpush.msra.mxu2 %v3140_v54  ;;  %1407 = vmatpush.msra.mxu3 %v3141_v55  ;;  %v3244_v54 = vld [vmem:[%s3521_s23 + $0x730] sm:$0xff]  ;;  %v3245_v55 = vld [vmem:[%s3521_s23 + $0x738] sm:$0xff] }
  0x87   : > { %1338 = vmatpush.msra.mxu0 %v3138_v56  ;;  %1361 = vmatpush.msra.mxu1 %v3139_v57 }
  0x8a   : > { %3127 = vmatmul.msk.f32.vlgmr.msrb.gmra.mxu0 %vm247_vm1, %v3550_v20  ;;  %3130 = vmatmul.msk.f32.vlgmr.msrb.gmra.mxu1 %vm247_vm1, %v3550_v20 }
  0x8b   : > { %3133 = vmatmul.msk.f32.vlgmr.msrb.gmra.mxu2 %vm247_vm1, %v3550_v20  ;;  %3136 = vmatmul.msk.f32.vlgmr.msrb.gmra.mxu3 %vm247_vm1, %v3550_v20 }
  0x8c   : > { %3196 = vmatpush.msk.msrb.mxu2 %vm254_vm0, %v3188_v58  ;;  %3199 = vmatpush.msk.msrb.mxu3 %vm254_vm0, %v3189_v59  ;;  %v3243_v58 = vld [vmem:[%s3521_s23 + $0x728] sm:$0xff] }
  0x8d   : > { %3190 = vmatpush.msk.msrb.mxu0 %vm254_vm0, %v3186_v60  ;;  %3193 = vmatpush.msk.msrb.mxu1 %vm254_vm0, %v3187_v61 }
  0x8e   : > { %1514 = vmatpush.msrb.mxu2 %v3184_v62  ;;  %1537 = vmatpush.msrb.mxu3 %v3185_v63  ;;  %v3240_v63 = vld [vmem:[%s3521_s23 + $0x710] sm:$0xff] }
  0x8f   : > { %1468 = vmatpush.msrb.mxu0 %v3182_v0  ;;  %1491 = vmatpush.msrb.mxu1 %v3183_v1  ;;  %v3241_v0 = vld [vmem:[%s3521_s23 + $0x718] sm:$0xff]  ;;  %v3238_v1 = vld [vmem:[%s3521_s23 + $0x700] sm:$0xff] }
  0x90   : > { %1515 = vmatpush.msrb.mxu2 %v3180_v2  ;;  %1538 = vmatpush.msrb.mxu3 %v3181_v3  ;;  %v3239_v2 = vld [vmem:[%s3521_s23 + $0x708] sm:$0xff]  ;;  %v3236_v3 = vld [vmem:[%s3521_s23 + $0x6f0] sm:$0xff] }
  0x91   : > { %1469 = vmatpush.msrb.mxu0 %v3178_v4  ;;  %1492 = vmatpush.msrb.mxu1 %v3179_v5  ;;  %v3237_v4 = vld [vmem:[%s3521_s23 + $0x6f8] sm:$0xff]  ;;  %v3234_v5 = vld [vmem:[%s3521_s23 + $0x6e0] sm:$0xff] }
  0x92   : > { %3128 = vmatmul.msk.f32.gmra.mxu0 %vm247_vm1, %v3579_v33  ;;  %3131 = vmatmul.msk.f32.gmra.mxu1 %vm247_vm1, %v3579_v33 }
  0x93   : > { %3134 = vmatmul.msk.f32.gmra.mxu2 %vm247_vm1, %v3579_v33  ;;  %3137 = vmatmul.msk.f32.gmra.mxu3 %vm247_vm1, %v3579_v33 }
  0x94   : > { %1516 = vmatpush.msrb.mxu2 %v3176_v6  ;;  %1539 = vmatpush.msrb.mxu3 %v3177_v7  ;;  %v3235_v6 = vld [vmem:[%s3521_s23 + $0x6e8] sm:$0xff] }
  0x95   : > { %1470 = vmatpush.msrb.mxu0 %v3174_v8  ;;  %1493 = vmatpush.msrb.mxu1 %v3175_v9 }
  0x96   : > { %1517 = vmatpush.msrb.mxu2 %v3172_v10  ;;  %1540 = vmatpush.msrb.mxu3 %v3173_v11 }
  0x97   : > { %v3901_v14 = vpop.f32.mrf.mxu0  ;;  %v3903_v15 = vpop.f32.mrf.mxu1  ;;  %1471 = vmatpush.msrb.mxu0 %v3170_v12  ;;  %1494 = vmatpush.msrb.mxu1 %v3171_v13  ;;  %v3284_v12 = vld [vmem:[%s3521_s23 + $0x810] sm:$0xf]  ;;  %v3285_v13 = vld [vmem:[%s3521_s23 + $0x818] sm:$0xf] }
  0x9a   : > { %3159 = vmatmul.msk.f32.vlgmr.msra.gmra.mxu0 %vm247_vm1, %v3550_v20  ;;  %3162 = vmatmul.msk.f32.vlgmr.msra.gmra.mxu1 %vm247_vm1, %v3550_v20 }
  0x9b   : > { %3165 = vmatmul.msk.f32.vlgmr.msra.gmra.mxu2 %vm247_vm1, %v3550_v20  ;;  %3168 = vmatmul.msk.f32.vlgmr.msra.gmra.mxu3 %vm247_vm1, %v3550_v20 }
  0x9c   : > { %3228 = vmatpush.msk.msra.mxu2 %vm254_vm0, %v3220_v16  ;;  %3231 = vmatpush.msk.msra.mxu3 %vm254_vm0, %v3221_v17  ;;  %v4030_v16 = vld [vmem:[%s4688_s1] sm:$0xff] }
  0x9d   : > { %3222 = vmatpush.msk.msra.mxu0 %vm254_vm0, %v3218_v18  ;;  %3225 = vmatpush.msk.msra.mxu1 %vm254_vm0, %v3219_v19  ;;  %v3282_v17 = vld [vmem:[%s3521_s23 + $0x800] sm:$0xf]  ;;  %v3283_v18 = vld [vmem:[%s3521_s23 + $0x808] sm:$0xf]  ;;  %v3280_v19 = vld [vmem:[%s3521_s23 + $0x7f0] sm:$0xff] }
  0x9e   : > { %v3927_v27 = vpop.f32.mrf.mxu2  ;;  %v3929_v28 = vpop.f32.mrf.mxu3  ;;  %1647 = vmatpush.msra.mxu2 %v3216_v21  ;;  %1670 = vmatpush.msra.mxu3 %v3217_v22  ;;  %v3281_v21 = vld [vmem:[%s3521_s23 + $0x7f8] sm:$0xff]  ;;  %v3278_v22 = vld [vmem:[%s3521_s23 + $0x7e0] sm:$0xff] }
  0x9f   : > { %v3933_v31 = vpop.f32.mrf.mxu0  ;;  %v3935_v32 = vpop.f32.mrf.mxu1  ;;  %1601 = vmatpush.msra.mxu0 %v3214_v23  ;;  %1624 = vmatpush.msra.mxu1 %v3215_v24  ;;  %v3279_v23 = vld [vmem:[%s3521_s23 + $0x7e8] sm:$0xff]  ;;  %v3276_v24 = vld [vmem:[%s3521_s23 + $0x7d0] sm:$0xff] }
  0xa0   : > { %1648 = vmatpush.msra.mxu2 %v3212_v25  ;;  %1671 = vmatpush.msra.mxu3 %v3213_v26  ;;  %v3277_v25 = vld [vmem:[%s3521_s23 + $0x7d8] sm:$0xff] }
  0xa1   : > { %1602 = vmatpush.msra.mxu0 %v3210_v29  ;;  %1625 = vmatpush.msra.mxu1 %v3211_v30  ;;  %v3275_v29 = vld [vmem:[%s3521_s23 + $0x7c8] sm:$0xff] }
  0xa2   : > { %3160 = vmatmul.msk.f32.gmra.mxu0 %vm247_vm1, %v3579_v33  ;;  %3163 = vmatmul.msk.f32.gmra.mxu1 %vm247_vm1, %v3579_v33 }
  0xa3   : > { %3166 = vmatmul.msk.f32.gmra.mxu2 %vm247_vm1, %v3579_v33  ;;  %3169 = vmatmul.msk.f32.gmra.mxu3 %vm247_vm1, %v3579_v33 }
  0xa4   : > { %1649 = vmatpush.msra.mxu2 %v3208_v34  ;;  %1672 = vmatpush.msra.mxu3 %v3209_v35 }
  0xa5   : > { %1603 = vmatpush.msra.mxu0 %v3206_v36  ;;  %1626 = vmatpush.msra.mxu1 %v3207_v37  ;;  %v3272_v37 = vld [vmem:[%s3521_s23 + $0x7b0] sm:$0xff] }
  0xa6   : > { %v3953_v42 = vpop.f32.mrf.mxu2  ;;  %v3955_v43 = vpop.f32.mrf.mxu3  ;;  %1650 = vmatpush.msra.mxu2 %v3204_v38  ;;  %1673 = vmatpush.msra.mxu3 %v3205_v39  ;;  %v3273_v38 = vld [vmem:[%s3521_s23 + $0x7b8] sm:$0xff]  ;;  %v4067_v39 = vld [vmem:[%s4688_s1 + $0x8] sm:$0xff] }
  0xa7   : > { %v3957_v44 = vpop.f32.mrf.mxu0  ;;  %v3959_v45 = vpop.f32.mrf.mxu1  ;;  %1604 = vmatpush.msra.mxu0 %v3202_v40  ;;  %1627 = vmatpush.msra.mxu1 %v3203_v41  ;;  %v3270_v40 = vld [vmem:[%s3521_s23 + $0x7a0] sm:$0xff]  ;;  %v3271_v41 = vld [vmem:[%s3521_s23 + $0x7a8] sm:$0xff] }
  0xaa   : > { %3191 = vmatmul.msk.f32.vlgmr.msrb.gmra.mxu0 %vm247_vm1, %v3550_v20  ;;  %3194 = vmatmul.msk.f32.vlgmr.msrb.gmra.mxu1 %vm247_vm1, %v3550_v20 }
  0xab   : > { %3197 = vmatmul.msk.f32.vlgmr.msrb.gmra.mxu2 %vm247_vm1, %v3550_v20  ;;  %3200 = vmatmul.msk.f32.vlgmr.msrb.gmra.mxu3 %vm247_vm1, %v3550_v20  ;;  %v3242_v20 = vld [vmem:[%s3521_s23 + $0x720] sm:$0xff] }
  0xac   : > { %3260 = vmatpush.msk.msrb.mxu2 %vm254_vm0, %v3252_v46  ;;  %3263 = vmatpush.msk.msrb.mxu3 %vm254_vm0, %v3253_v47  ;;  %v3266_v46 = vld [vmem:[%s3521_s23 + $0x780] sm:$0xff]  ;;  %v3267_v47 = vld [vmem:[%s3521_s23 + $0x788] sm:$0xff] }
  0xad   : > { %3254 = vmatpush.msk.msrb.mxu0 %vm254_vm0, %v3250_v48  ;;  %3257 = vmatpush.msk.msrb.mxu1 %vm254_vm0, %v3251_v49 }
  0xae   : > { %v3983_v56 = vpop.f32.mrf.mxu2  ;;  %v3985_v57 = vpop.f32.mrf.mxu3  ;;  %1780 = vmatpush.msrb.mxu2 %v3248_v50  ;;  %1803 = vmatpush.msrb.mxu3 %v3249_v51 }
  0xaf   : > { %v486_v59 = vmax.f32 %v3927_v27, %v3983_v56  ;;  %v487_v60 = vmax.f32 %v3929_v28, %v3985_v57  ;;  %v3993_v61 = vpop.f32.mrf.mxu0  ;;  %v3995_v62 = vpop.f32.mrf.mxu1  ;;  %1734 = vmatpush.msrb.mxu0 %v3246_v52  ;;  %1757 = vmatpush.msrb.mxu1 %v3247_v53  ;;  %v3274_v28 = vld [vmem:[%s3521_s23 + $0x7c0] sm:$0xff]  ;;  %v3315_v57 = vld [vmem:[%s3521_s23 + $0x8a8] sm:$0xf] }
  0xb0   : > { %1781 = vmatpush.msrb.mxu2 %v3244_v54  ;;  %1804 = vmatpush.msrb.mxu3 %v3245_v55  ;;  %v3316_v54 = vld [vmem:[%s3521_s23 + $0x8b0] sm:$0xf]  ;;  %v3317_v55 = vld [vmem:[%s3521_s23 + $0x8b8] sm:$0xf]  ;;  %v3314_v56 = vld [vmem:[%s3521_s23 + $0x8a0] sm:$0xf] }
  0xb1   : > { %1735 = vmatpush.msrb.mxu0 %v3242_v20  ;;  %1758 = vmatpush.msrb.mxu1 %v3243_v58  ;;  %v3312_v20 = vld [vmem:[%s3521_s23 + $0x890] sm:$0xff]  ;;  %v3313_v58 = vld [vmem:[%s3521_s23 + $0x898] sm:$0xff] }
  0xb2   : > { %3192 = vmatmul.msk.f32.gmra.mxu0 %vm247_vm1, %v3579_v33  ;;  %3195 = vmatmul.msk.f32.gmra.mxu1 %vm247_vm1, %v3579_v33 }
  0xb3   : > { %3198 = vmatmul.msk.f32.gmra.mxu2 %vm247_vm1, %v3579_v33  ;;  %3201 = vmatmul.msk.f32.gmra.mxu3 %vm247_vm1, %v3579_v33 }
  0xb4   : > { %1782 = vmatpush.msrb.mxu2 %v3240_v63  ;;  %1805 = vmatpush.msrb.mxu3 %v3241_v0  ;;  %v3308_v63 = vld [vmem:[%s3521_s23 + $0x870] sm:$0xff]  ;;  %v3309_v0 = vld [vmem:[%s3521_s23 + $0x878] sm:$0xff] }
  0xb5   : > { %1736 = vmatpush.msrb.mxu0 %v3238_v1  ;;  %1759 = vmatpush.msrb.mxu1 %v3239_v2 }
  0xb6   : > { %v4013_v7 = vpop.f32.mrf.mxu2  ;;  %v4015_v8 = vpop.f32.mrf.mxu3  ;;  %1783 = vmatpush.msrb.mxu2 %v3236_v3  ;;  %1806 = vmatpush.msrb.mxu3 %v3237_v4  ;;  %v3306_v3 = vld [vmem:[%s3521_s23 + $0x860] sm:$0xff]  ;;  %v3307_v4 = vld [vmem:[%s3521_s23 + $0x868] sm:$0xff] }
  0xb7   : > { %v490_v33 = vmax.f32 %v3953_v42, %v4013_v7  ;;  %v491_v9 = vmax.f32 %v3955_v43, %v4015_v8  ;;  %v4021_v10 = vpop.f32.mrf.mxu0  ;;  %v4023_v11 = vpop.f32.mrf.mxu1  ;;  %1737 = vmatpush.msrb.mxu0 %v3234_v5  ;;  %1760 = vmatpush.msrb.mxu1 %v3235_v6  ;;  %v3268_v42 = vld [vmem:[%s3521_s23 + $0x790] sm:$0xff]  ;;  %v3269_v43 = vld [vmem:[%s3521_s23 + $0x798] sm:$0xff] }
  0xba   : > { %3223 = vmatmul.msk.f32.vlgmr.msra.gmra.mxu0 %vm247_vm1, %v4030_v16  ;;  %3226 = vmatmul.msk.f32.vlgmr.msra.gmra.mxu1 %vm247_vm1, %v4030_v16 }
  0xbb   : > { %3229 = vmatmul.msk.f32.vlgmr.msra.gmra.mxu2 %vm247_vm1, %v4030_v16  ;;  %3232 = vmatmul.msk.f32.vlgmr.msra.gmra.mxu3 %vm247_vm1, %v4030_v16 }
  0xbc   : > { %3292 = vmatpush.msk.msra.mxu2 %vm254_vm0, %v3284_v12  ;;  %3295 = vmatpush.msk.msra.mxu3 %vm254_vm0, %v3285_v13  ;;  %v484_v12 = vmax.f32 %v3901_v14, %v3957_v44  ;;  %v485_v13 = vmax.f32 %v3903_v15, %v3959_v45  ;;  %v3298_v44 = vld [vmem:[%s3521_s23 + $0x820] sm:$0xff]  ;;  %v3299_v45 = vld [vmem:[%s3521_s23 + $0x828] sm:$0xff] }
  0xbd   : > { %3286 = vmatpush.msk.msra.mxu0 %vm254_vm0, %v3282_v17  ;;  %3289 = vmatpush.msk.msra.mxu1 %vm254_vm0, %v3283_v18  ;;  %v3302_v17 = vld [vmem:[%s3521_s23 + $0x840] sm:$0xff]  ;;  %v3303_v18 = vld [vmem:[%s3521_s23 + $0x848] sm:$0xff] }
  0xbe   : > { %v588_v26 = vpop.f32.mrf.mxu2  ;;  %v611_v27 = vpop.f32.mrf.mxu3  ;;  %1913 = vmatpush.msra.mxu2 %v3280_v19  ;;  %1936 = vmatpush.msra.mxu3 %v3281_v21  ;;  %v3300_v19 = vld [vmem:[%s3521_s23 + $0x830] sm:$0xff]  ;;  %v3301_v21 = vld [vmem:[%s3521_s23 + $0x838] sm:$0xff]  ;;  %v617_v14 = vmax.f32 %v484_v12, %v4021_v10  ;;  %v618_v15 = vmax.f32 %v485_v13, %v4023_v11 }
  0xbf   : > { %v4054_v30 = vmax.f32 %v486_v59, %v588_v26  ;;  %v4056_v34 = vmax.f32 %v487_v60, %v611_v27  ;;  %v4058_v35 = vpop.f32.mrf.mxu0  ;;  %v4060_v36 = vpop.f32.mrf.mxu1  ;;  %1867 = vmatpush.msra.mxu0 %v3278_v22  ;;  %1890 = vmatpush.msra.mxu1 %v3279_v23  ;;  %v3310_v59 = vld [vmem:[%s3521_s23 + $0x880] sm:$0xff]  ;;  %v3311_v60 = vld [vmem:[%s3521_s23 + $0x888] sm:$0xff]  ;;  %v3380_v13 = vld [vmem:[%s3521_s23 + $0x9f0] sm:$0xf] }
  0xc0   : > { %1914 = vmatpush.msra.mxu2 %v3276_v24  ;;  %1937 = vmatpush.msra.mxu3 %v3277_v25 }
  0xc1   : > { %1868 = vmatpush.msra.mxu0 %v3274_v28  ;;  %1891 = vmatpush.msra.mxu1 %v3275_v29 }
  0xc2   : > { %3224 = vmatmul.msk.f32.gmra.mxu0 %vm247_vm1, %v4067_v39  ;;  %3227 = vmatmul.msk.f32.gmra.mxu1 %vm247_vm1, %v4067_v39 }
  0xc3   : > { %3230 = vmatmul.msk.f32.gmra.mxu2 %vm247_vm1, %v4067_v39  ;;  %3233 = vmatmul.msk.f32.gmra.mxu3 %vm247_vm1, %v4067_v39 }
  0xc4   : > { %1915 = vmatpush.msra.mxu2 %v3272_v37  ;;  %1938 = vmatpush.msra.mxu3 %v3273_v38  ;;  %v3348_v37 = vld [vmem:[%s3521_s23 + $0x950] sm:$0xf]  ;;  %v3349_v38 = vld [vmem:[%s3521_s23 + $0x958] sm:$0xf] }
  0xc5   : > { %1869 = vmatpush.msra.mxu0 %v3270_v40  ;;  %1892 = vmatpush.msra.mxu1 %v3271_v41  ;;  %v488_v40 = vmax.f32 %v3933_v31, %v3993_v61  ;;  %v489_v41 = vmax.f32 %v3935_v32, %v3995_v62  ;;  %v3344_v31 = vld [vmem:[%s3521_s23 + $0x930] sm:$0xff]  ;;  %v3345_v61 = vld [vmem:[%s3521_s23 + $0x938] sm:$0xff] }
  0xc6   : > { %v591_v48 = vpop.f32.mrf.mxu2  ;;  %v614_v49 = vpop.f32.mrf.mxu3  ;;  %1916 = vmatpush.msra.mxu2 %v3268_v42  ;;  %1939 = vmatpush.msra.mxu3 %v3269_v43  ;;  %v3346_v42 = vld [vmem:[%s3521_s23 + $0x940] sm:$0xf]  ;;  %v3347_v43 = vld [vmem:[%s3521_s23 + $0x948] sm:$0xf] }
  0xc7   : > { %v4083_v50 = vmax.f32 %v490_v33, %v591_v48  ;;  %v4085_v51 = vmax.f32 %v491_v9, %v614_v49  ;;  %v4087_v52 = vpop.f32.mrf.mxu0  ;;  %v4089_v53 = vpop.f32.mrf.mxu1  ;;  %1870 = vmatpush.msra.mxu0 %v3266_v46  ;;  %1893 = vmatpush.msra.mxu1 %v3267_v47  ;;  %v3304_v33 = vld [vmem:[%s3521_s23 + $0x850] sm:$0xff]  ;;  %v3305_v9 = vld [vmem:[%s3521_s23 + $0x858] sm:$0xff]  ;;  %v621_v32 = vmax.f32 %v488_v40, %v4058_v35  ;;  %v3342_v46 = vld [vmem:[%s3521_s23 + $0x920] sm:$0xff] }
  0xc8   : > { %v750_v22 = vmax.f32 %v617_v14, %v4087_v52  ;;  %v751_v23 = vmax.f32 %v618_v15, %v4089_v53  ;;  %v622_v62 = vmax.f32 %v489_v41, %v4060_v36  ;;  %v3343_v47 = vld [vmem:[%s3521_s23 + $0x928] sm:$0xff]  ;;  %v3340_v48 = vld [vmem:[%s3521_s23 + $0x910] sm:$0xff]  ;;  %v3341_v49 = vld [vmem:[%s3521_s23 + $0x918] sm:$0xff] }
  0xc9   : > { %v3374_v14 = vld [vmem:[%s3521_s23 + $0x9c0] sm:$0xff]  ;;  %v3375_v15 = vld [vmem:[%s3521_s23 + $0x9c8] sm:$0xff]  ;;  %v3368_v40 = vld [vmem:[%s3521_s23 + $0x990] sm:$0xff] }
  0xca   : > { %3255 = vmatmul.msk.f32.vlgmr.msrb.gmra.mxu0 %vm247_vm1, %v4030_v16  ;;  %3258 = vmatmul.msk.f32.vlgmr.msrb.gmra.mxu1 %vm247_vm1, %v4030_v16  ;;  %v3369_v41 = vld [vmem:[%s3521_s23 + $0x998] sm:$0xff] }
  0xcb   : > { %3261 = vmatmul.msk.f32.vlgmr.msrb.gmra.mxu2 %vm247_vm1, %v4030_v16  ;;  %3264 = vmatmul.msk.f32.vlgmr.msrb.gmra.mxu3 %vm247_vm1, %v4030_v16 }
  0xcc   : > { %3324 = vmatpush.msk.msrb.mxu2 %vm254_vm0, %v3316_v54  ;;  %3327 = vmatpush.msk.msrb.mxu3 %vm254_vm0, %v3317_v55  ;;  %v3338_v54 = vld [vmem:[%s3521_s23 + $0x900] sm:$0xff]  ;;  %v3339_v55 = vld [vmem:[%s3521_s23 + $0x908] sm:$0xff] }
  0xcd   : > { %3318 = vmatpush.msk.msrb.mxu0 %vm254_vm0, %v3314_v56  ;;  %3321 = vmatpush.msk.msrb.mxu1 %vm254_vm0, %v3315_v57 }
  0xce   : > { %v4113_v1 = vpop.f32.mrf.mxu2  ;;  %v4115_v2 = vpop.f32.mrf.mxu3  ;;  %2046 = vmatpush.msrb.mxu2 %v3312_v20  ;;  %2069 = vmatpush.msrb.mxu3 %v3313_v58 }
  0xcf   : > { %v752_v5 = vmax.f32 %v4054_v30, %v4113_v1  ;;  %v753_v6 = vmax.f32 %v4056_v34, %v4115_v2  ;;  %v4123_v7 = vpop.f32.mrf.mxu0  ;;  %v4125_v8 = vpop.f32.mrf.mxu1  ;;  %2000 = vmatpush.msrb.mxu0 %v3310_v59  ;;  %2023 = vmatpush.msrb.mxu1 %v3311_v60  ;;  %v3336_v30 = vld [vmem:[%s3521_s23 + $0x8f0] sm:$0xff]  ;;  %v3337_v34 = vld [vmem:[%s3521_s23 + $0x8f8] sm:$0xff] }
  0xd0   : > { %2047 = vmatpush.msrb.mxu2 %v3308_v63  ;;  %2070 = vmatpush.msrb.mxu3 %v3309_v0  ;;  %v754_v52 = vmax.f32 %v621_v32, %v4123_v7  ;;  %v755_v35 = vmax.f32 %v622_v62, %v4125_v8  ;;  %v3334_v63 = vld [vmem:[%s3521_s23 + $0x8e0] sm:$0xff]  ;;  %v3335_v0 = vld [vmem:[%s3521_s23 + $0x8e8] sm:$0xff]  ;;  %v3332_v1 = vld [vmem:[%s3521_s23 + $0x8d0] sm:$0xff] }
  0xd1   : > { %2001 = vmatpush.msrb.mxu0 %v3306_v3  ;;  %2024 = vmatpush.msrb.mxu1 %v3307_v4  ;;  %v3333_v2 = vld [vmem:[%s3521_s23 + $0x8d8] sm:$0xff]  ;;  %v3330_v3 = vld [vmem:[%s3521_s23 + $0x8c0] sm:$0xff]  ;;  %v3331_v4 = vld [vmem:[%s3521_s23 + $0x8c8] sm:$0xff] }
  0xd2   : > { %3256 = vmatmul.msk.f32.gmra.mxu0 %vm247_vm1, %v4067_v39  ;;  %3259 = vmatmul.msk.f32.gmra.mxu1 %vm247_vm1, %v4067_v39  ;;  %v3362_v32 = vld [vmem:[%s3521_s23 + $0x960] sm:$0xff]  ;;  %v3363_v62 = vld [vmem:[%s3521_s23 + $0x968] sm:$0xff] }
  0xd3   : > { %3262 = vmatmul.msk.f32.gmra.mxu2 %vm247_vm1, %v4067_v39  ;;  %3265 = vmatmul.msk.f32.gmra.mxu3 %vm247_vm1, %v4067_v39 }
  0xd4   : > { %2048 = vmatpush.msrb.mxu2 %v3304_v33  ;;  %2071 = vmatpush.msrb.mxu3 %v3305_v9 }
  0xd5   : > { %2002 = vmatpush.msrb.mxu0 %v3302_v17  ;;  %2025 = vmatpush.msrb.mxu1 %v3303_v18  ;;  %v3378_v17 = vld [vmem:[%s3521_s23 + $0x9e0] sm:$0xf]  ;;  %v3379_v18 = vld [vmem:[%s3521_s23 + $0x9e8] sm:$0xf] }
  0xd6   : > { %v4151_v24 = vpop.f32.mrf.mxu2  ;;  %v4153_v25 = vpop.f32.mrf.mxu3  ;;  %2049 = vmatpush.msrb.mxu2 %v3300_v19  ;;  %2072 = vmatpush.msrb.mxu3 %v3301_v21  ;;  %v3376_v19 = vld [vmem:[%s3521_s23 + $0x9d0] sm:$0xff]  ;;  %v3377_v21 = vld [vmem:[%s3521_s23 + $0x9d8] sm:$0xff] }
  0xd7   : > { %v756_v10 = vmax.f32 %v4083_v50, %v4151_v24  ;;  %v757_v11 = vmax.f32 %v4085_v51, %v4153_v25  ;;  %v808_v26 = vpop.f32.mrf.mxu0  ;;  %v831_v27 = vpop.f32.mrf.mxu1  ;;  %2003 = vmatpush.msrb.mxu0 %v3298_v44  ;;  %2026 = vmatpush.msrb.mxu1 %v3299_v45  ;;  %v3381_v51 = vld [vmem:[%s3521_s23 + $0x9f8] sm:$0xf]  ;;  %v3372_v44 = vld [vmem:[%s3521_s23 + $0x9b0] sm:$0xff]  ;;  %v3370_v24 = vld [vmem:[%s3521_s23 + $0x9a0] sm:$0xff] }
  0xd8   : > { %v4159_v28 = vmax.f32 %v750_v22, %v808_v26  ;;  %v4161_v29 = vmax.f32 %v751_v23, %v831_v27  ;;  %v3373_v45 = vld [vmem:[%s3521_s23 + $0x9b8] sm:$0xff]  ;;  %v3371_v25 = vld [vmem:[%s3521_s23 + $0x9a8] sm:$0xff] }
  0xda   : > { %3287 = vmatmul.msk.f32.vlgmr.msra.gmra.mxu0 %vm247_vm1, %v4030_v16  ;;  %3290 = vmatmul.msk.f32.vlgmr.msra.gmra.mxu1 %vm247_vm1, %v4030_v16 }
  0xdb   : > { %3293 = vmatmul.msk.f32.vlgmr.msra.gmra.mxu2 %vm247_vm1, %v4030_v16  ;;  %3296 = vmatmul.msk.f32.vlgmr.msra.gmra.mxu3 %vm247_vm1, %v4030_v16 }
  0xdc   : > { %3356 = vmatpush.msk.msra.mxu2 %vm254_vm0, %v3348_v37  ;;  %3359 = vmatpush.msk.msra.mxu3 %vm254_vm0, %v3349_v38 }
  0xdd   : > { %3350 = vmatpush.msk.msra.mxu0 %vm254_vm0, %v3346_v42  ;;  %3353 = vmatpush.msk.msra.mxu1 %vm254_vm0, %v3347_v43  ;;  %v3366_v42 = vld [vmem:[%s3521_s23 + $0x980] sm:$0xff]  ;;  %v3367_v43 = vld [vmem:[%s3521_s23 + $0x988] sm:$0xff] }
  0xde   : > { %v854_v53 = vpop.f32.mrf.mxu2  ;;  %v877_v36 = vpop.f32.mrf.mxu3  ;;  %2179 = vmatpush.msra.mxu2 %v3344_v31  ;;  %2202 = vmatpush.msra.mxu3 %v3345_v61  ;;  %v3364_v31 = vld [vmem:[%s3521_s23 + $0x970] sm:$0xff]  ;;  %v3365_v61 = vld [vmem:[%s3521_s23 + $0x978] sm:$0xff] }
  0xdf   : > { %v4198_v56 = vmax.f32 %v752_v5, %v854_v53  ;;  %v4203_v57 = vmax.f32 %v753_v6, %v877_v36  ;;  %v811_v20 = vpop.f32.mrf.mxu0  ;;  %v834_v58 = vpop.f32.mrf.mxu1  ;;  %2133 = vmatpush.msra.mxu0 %v3342_v46  ;;  %2156 = vmatpush.msra.mxu1 %v3343_v47 }
  0xe0   : > { %v4205_v59 = vmax.f32 %v754_v52, %v811_v20  ;;  %v4207_v60 = vmax.f32 %v755_v35, %v834_v58  ;;  %2180 = vmatpush.msra.mxu2 %v3340_v48  ;;  %2203 = vmatpush.msra.mxu3 %v3341_v49  ;;  %v2354_v48 = vld [vmem:[%s4689_s2] sm:$0xff] }
  0xe1   : > { %2134 = vmatpush.msra.mxu0 %v3338_v54  ;;  %2157 = vmatpush.msra.mxu1 %v3339_v55  ;;  %v3474_v55 = vmov 0  }
  0xe2   : > { %3288 = vmatmul.msk.f32.gmra.mxu0 %vm247_vm1, %v4067_v39  ;;  %3291 = vmatmul.msk.f32.gmra.mxu1 %vm247_vm1, %v4067_v39 }
  0xe3   : > { %3294 = vmatmul.msk.f32.gmra.mxu2 %vm247_vm1, %v4067_v39  ;;  %3297 = vmatmul.msk.f32.gmra.mxu3 %vm247_vm1, %v4067_v39 }
  0xe4   : > { %2181 = vmatpush.msra.mxu2 %v3336_v30  ;;  %2204 = vmatpush.msra.mxu3 %v3337_v34 }
  0xe5   : > { %2135 = vmatpush.msra.mxu0 %v3334_v63  ;;  %2158 = vmatpush.msra.mxu1 %v3335_v0 }
  0xe6   : > { %v857_v5 = vpop.f32.mrf.mxu2  ;;  %v880_v6 = vpop.f32.mrf.mxu3  ;;  %2182 = vmatpush.msra.mxu2 %v3332_v1  ;;  %2205 = vmatpush.msra.mxu3 %v3333_v2 }
  0xe7   : > { %v4228_v7 = vmax.f32 %v756_v10, %v857_v5  ;;  %v4233_v8 = vmax.f32 %v757_v11, %v880_v6  ;;  %v4235_v33 = vpop.f32.mrf.mxu0  ;;  %v4237_v9 = vpop.f32.mrf.mxu1  ;;  %2136 = vmatpush.msra.mxu0 %v3330_v3  ;;  %2159 = vmatpush.msra.mxu1 %v3331_v4 }
  0xe8   : > { %v1016_v50 = vmax.f32 %v4159_v28, %v4235_v33  ;;  %v1017_v12 = vmax.f32 %v4161_v29, %v4237_v9  ;;  %3409 = vset.pattern.permute.xlu0 %v3474_v55  ;;  %v2355_v29 = vld [vmem:[%s4689_s2 + $0x8] sm:$0xff] }
  0xe9   : > { %2358 = vperm.xlu0 %3409, %v2354_v48  }
  0xea   : > { %3319 = vmatmul.msk.f32.vlgmr.msrb.gmra.mxu0 %vm247_vm1, %v4030_v16  ;;  %3322 = vmatmul.msk.f32.vlgmr.msrb.gmra.mxu1 %vm247_vm1, %v4030_v16 }
  0xeb   : > { %3325 = vmatmul.msk.f32.vlgmr.msrb.gmra.mxu2 %vm247_vm1, %v4030_v16  ;;  %3328 = vmatmul.msk.f32.vlgmr.msrb.gmra.mxu3 %vm247_vm1, %v4030_v16 }
  0xec   : > { %3388 = vmatpush.msk.msrb.mxu2 %vm254_vm0, %v3380_v13  ;;  %3391 = vmatpush.msk.msrb.mxu3 %vm254_vm0, %v3381_v51 }
  0xed   : > { %3382 = vmatpush.msk.msrb.mxu0 %vm254_vm0, %v3378_v17  ;;  %3385 = vmatpush.msk.msrb.mxu1 %vm254_vm0, %v3379_v18 }
  0xee   : > { %v987_v22 = vpop.f32.mrf.mxu2  ;;  %v1010_v23 = vpop.f32.mrf.mxu3  ;;  %2312 = vmatpush.msrb.mxu2 %v3376_v19  ;;  %2335 = vmatpush.msrb.mxu3 %v3377_v21 }
  0xef   : > { %v1018_v10 = vmax.f32 %v4198_v56, %v987_v22  ;;  %v1019_v11 = vmax.f32 %v4203_v57, %v1010_v23  ;;  %v944_v26 = vpop.f32.mrf.mxu0  ;;  %v967_v27 = vpop.f32.mrf.mxu1  ;;  %2266 = vmatpush.msrb.mxu0 %v3374_v14  ;;  %2289 = vmatpush.msrb.mxu1 %v3375_v15 }
  0xf0   : > { %v1020_v37 = vmax.f32 %v4205_v59, %v944_v26  ;;  %v1021_v38 = vmax.f32 %v4207_v60, %v967_v27  ;;  %2313 = vmatpush.msrb.mxu2 %v3372_v44  ;;  %2336 = vmatpush.msrb.mxu3 %v3373_v45 }
  0xf1   : > { %2267 = vmatpush.msrb.mxu0 %v3370_v24  ;;  %2290 = vmatpush.msrb.mxu1 %v3371_v25 }
  0xf2   : > { %3320 = vmatmul.msk.f32.gmra.mxu0 %vm247_vm1, %v4067_v39  ;;  %3323 = vmatmul.msk.f32.gmra.mxu1 %vm247_vm1, %v4067_v39 }
  0xf3   : > { %3326 = vmatmul.msk.f32.gmra.mxu2 %vm247_vm1, %v4067_v39  ;;  %3329 = vmatmul.msk.f32.gmra.mxu3 %vm247_vm1, %v4067_v39 }
  0xf4   : > { %2314 = vmatpush.msrb.mxu2 %v3368_v40  ;;  %2337 = vmatpush.msrb.mxu3 %v3369_v41 }
  0xf5   : > { %2268 = vmatpush.msrb.mxu0 %v3366_v42  ;;  %2291 = vmatpush.msrb.mxu1 %v3367_v43 }
  0xf6   : > { %v990_v46 = vpop.f32.mrf.mxu2  ;;  %v1013_v47 = vpop.f32.mrf.mxu3  ;;  %2315 = vmatpush.msrb.mxu2 %v3364_v31  ;;  %2338 = vmatpush.msrb.mxu3 %v3365_v61 }
  0xf7   : > { %v1022_v49 = vmax.f32 %v4228_v7, %v990_v46  ;;  %v1023_v52 = vmax.f32 %v4233_v8, %v1013_v47  ;;  %v1074_v35 = vpop.f32.mrf.mxu0  ;;  %v1097_v53 = vpop.f32.mrf.mxu1  ;;  %2269 = vmatpush.msrb.mxu0 %v3362_v32  ;;  %2292 = vmatpush.msrb.mxu1 %v3363_v62 }
  0xf8   : > { %v1149_v36 = vmax.f32 %v1016_v50, %v1074_v35  ;;  %v1150_v54 = vmax.f32 %v1017_v12, %v1097_v53  ;;  %2363 = vperm.xlu0 %3409, %v2355_v29  }
  0xfa   : > { %3351 = vmatmul.msk.f32.vlgmr.msra.gmra.mxu0 %vm247_vm1, %v4030_v16  ;;  %3354 = vmatmul.msk.f32.vlgmr.msra.gmra.mxu1 %vm247_vm1, %v4030_v16 }
  0xfb   : > { %3357 = vmatmul.msk.f32.vlgmr.msra.gmra.mxu2 %vm247_vm1, %v4030_v16  ;;  %3360 = vmatmul.msk.f32.vlgmr.msra.gmra.mxu3 %vm247_vm1, %v4030_v16 }
  0xfe   : > { %v1120_v28 = vpop.f32.mrf.mxu2  ;;  %v1143_v56 = vpop.f32.mrf.mxu3 }
  0xff   : > { %v1151_v57 = vmax.f32 %v1018_v10, %v1120_v28  ;;  %v1152_v20 = vmax.f32 %v1019_v11, %v1143_v56  ;;  %v1077_v58 = vpop.f32.mrf.mxu0  ;;  %v1100_v59 = vpop.f32.mrf.mxu1 }
 0x100   : > { %v1153_v60 = vmax.f32 %v1020_v37, %v1077_v58  ;;  %v1154_v30 = vmax.f32 %v1021_v38, %v1100_v59 }
 0x102   : > { %3352 = vmatmul.msk.f32.gmra.mxu0 %vm247_vm1, %v4067_v39  ;;  %3355 = vmatmul.msk.f32.gmra.mxu1 %vm247_vm1, %v4067_v39 }
 0x103   : > { %3358 = vmatmul.msk.f32.gmra.mxu2 %vm247_vm1, %v4067_v39  ;;  %3361 = vmatmul.msk.f32.gmra.mxu3 %vm247_vm1, %v4067_v39 }
 0x106   : > { %v1123_v34 = vpop.f32.mrf.mxu2  ;;  %v1146_v63 = vpop.f32.mrf.mxu3 }
 0x107   : > { %v1155_v0 = vmax.f32 %v1022_v49, %v1123_v34  ;;  %v1156_v1 = vmax.f32 %v1023_v52, %v1146_v63  ;;  %v1207_v2 = vpop.f32.mrf.mxu0  ;;  %v1230_v3 = vpop.f32.mrf.mxu1 }
 0x108   : > { %v1282_v4 = vmax.f32 %v1149_v36, %v1207_v2  ;;  %v1283_v5 = vmax.f32 %v1150_v54, %v1230_v3 }
 0x10a   : > { %3383 = vmatmul.msk.f32.vlgmr.msrb.gmra.mxu0 %vm247_vm1, %v4030_v16  ;;  %3386 = vmatmul.msk.f32.vlgmr.msrb.gmra.mxu1 %vm247_vm1, %v4030_v16 }
 0x10b   : > { %3389 = vmatmul.msk.f32.vlgmr.msrb.gmra.mxu2 %vm247_vm1, %v4030_v16  ;;  %3392 = vmatmul.msk.f32.vlgmr.msrb.gmra.mxu3 %vm247_vm1, %v4030_v16 }
 0x10e   : > { %v1253_v6 = vpop.f32.mrf.mxu2  ;;  %v1276_v7 = vpop.f32.mrf.mxu3 }
 0x10f   : > { %v1284_v8 = vmax.f32 %v1151_v57, %v1253_v6  ;;  %v1285_v33 = vmax.f32 %v1152_v20, %v1276_v7  ;;  %v1210_v9 = vpop.f32.mrf.mxu0  ;;  %v1233_v50 = vpop.f32.mrf.mxu1 }
 0x110   : > { %v1286_v12 = vmax.f32 %v1153_v60, %v1210_v9  ;;  %v1287_v13 = vmax.f32 %v1154_v30, %v1233_v50 }
 0x112   : > { %3384 = vmatmul.msk.f32.gmra.mxu0 %vm247_vm1, %v4067_v39  ;;  %3387 = vmatmul.msk.f32.gmra.mxu1 %vm247_vm1, %v4067_v39 }
 0x113   : > { %3390 = vmatmul.msk.f32.gmra.mxu2 %vm247_vm1, %v4067_v39  ;;  %3393 = vmatmul.msk.f32.gmra.mxu3 %vm247_vm1, %v4067_v39 }
 0x116   : > { %v1256_v16 = vpop.f32.mrf.mxu2  ;;  %v1279_v51 = vpop.f32.mrf.mxu3 }
 0x117   : > { %v1288_v17 = vmax.f32 %v1155_v0, %v1256_v16  ;;  %v1289_v18 = vmax.f32 %v1156_v1, %v1279_v51  ;;  %v1340_v19 = vpop.f32.mrf.mxu0  ;;  %v1363_v21 = vpop.f32.mrf.mxu1 }
 0x118   : > { %v1415_v14 = vmax.f32 %v1282_v4, %v1340_v19  ;;  %v1416_v15 = vmax.f32 %v1283_v5, %v1363_v21 }
 0x11e   : > { %v1386_v44 = vpop.f32.mrf.mxu2  ;;  %v1409_v45 = vpop.f32.mrf.mxu3 }
 0x11f   : > { %v1417_v22 = vmax.f32 %v1284_v8, %v1386_v44  ;;  %v1418_v23 = vmax.f32 %v1285_v33, %v1409_v45  ;;  %v1343_v24 = vpop.f32.mrf.mxu0  ;;  %v1366_v25 = vpop.f32.mrf.mxu1 }
 0x120   : > { %v1419_v10 = vmax.f32 %v1286_v12, %v1343_v24  ;;  %v1420_v11 = vmax.f32 %v1287_v13, %v1366_v25 }
 0x126   : > { %v1389_v26 = vpop.f32.mrf.mxu2  ;;  %v1412_v27 = vpop.f32.mrf.mxu3 }
 0x127   : > { %v1421_v37 = vmax.f32 %v1288_v17, %v1389_v26  ;;  %v1422_v39 = vmax.f32 %v1289_v18, %v1412_v27  ;;  %v1473_v38 = vpop.f32.mrf.mxu0  ;;  %v1496_v40 = vpop.f32.mrf.mxu1 }
 0x128   : > { %v1548_v41 = vmax.f32 %v1415_v14, %v1473_v38  ;;  %v1549_v42 = vmax.f32 %v1416_v15, %v1496_v40 }
 0x12e   : > { %v1519_v43 = vpop.f32.mrf.mxu2  ;;  %v1542_v31 = vpop.f32.mrf.mxu3 }
 0x12f   : > { %v1550_v61 = vmax.f32 %v1417_v22, %v1519_v43  ;;  %v1551_v32 = vmax.f32 %v1418_v23, %v1542_v31  ;;  %v1476_v62 = vpop.f32.mrf.mxu0  ;;  %v1499_v46 = vpop.f32.mrf.mxu1 }
 0x130   : > { %v1552_v47 = vmax.f32 %v1419_v10, %v1476_v62  ;;  %v1553_v48 = vmax.f32 %v1420_v11, %v1499_v46 }
 0x136   : > { %v1522_v49 = vpop.f32.mrf.mxu2  ;;  %v1545_v52 = vpop.f32.mrf.mxu3 }
 0x137   : > { %v1554_v35 = vmax.f32 %v1421_v37, %v1522_v49  ;;  %v1555_v53 = vmax.f32 %v1422_v39, %v1545_v52  ;;  %v1606_v36 = vpop.f32.mrf.mxu0  ;;  %v1629_v54 = vpop.f32.mrf.mxu1 }
 0x138   : > { %v1681_v55 = vmax.f32 %v1548_v41, %v1606_v36  ;;  %v1682_v28 = vmax.f32 %v1549_v42, %v1629_v54 }
 0x13e   : > { %v1652_v56 = vpop.f32.mrf.mxu2  ;;  %v1675_v29 = vpop.f32.mrf.mxu3 }
 0x13f   : > { %v1683_v57 = vmax.f32 %v1550_v61, %v1652_v56  ;;  %v1684_v20 = vmax.f32 %v1551_v32, %v1675_v29  ;;  %v1609_v58 = vpop.f32.mrf.mxu0  ;;  %v1632_v59 = vpop.f32.mrf.mxu1 }
 0x140   : > { %v1685_v60 = vmax.f32 %v1552_v47, %v1609_v58  ;;  %v1686_v30 = vmax.f32 %v1553_v48, %v1632_v59 }
 0x146   : > { %v1655_v34 = vpop.f32.mrf.mxu2  ;;  %v1678_v63 = vpop.f32.mrf.mxu3 }
 0x147   : > { %v4333_v0 = vmax.f32 %v1554_v35, %v1655_v34  ;;  %v4335_v1 = vmax.f32 %v1555_v53, %v1678_v63  ;;  %v1739_v2 = vpop.f32.mrf.mxu0  ;;  %v1762_v3 = vpop.f32.mrf.mxu1 }
 0x148   : > { %v1814_v37 = vmax.f32 %v1681_v55, %v1739_v2  ;;  %v1815_v39 = vmax.f32 %v1682_v28, %v1762_v3 }
 0x14e   : > { %v1785_v4 = vpop.f32.mrf.mxu2  ;;  %v1808_v5 = vpop.f32.mrf.mxu3 }
 0x14f   : > { %v1742_v6 = vpop.f32.mrf.mxu0  ;;  %v1765_v7 = vpop.f32.mrf.mxu1  ;;  %v1816_v46 = vmax.f32 %v1683_v57, %v1785_v4  ;;  %v1817_v47 = vmax.f32 %v1684_v20, %v1808_v5 }
 0x150   : > { %v1818_v52 = vmax.f32 %v1685_v60, %v1742_v6  ;;  %v1819_v35 = vmax.f32 %v1686_v30, %v1765_v7 }
 0x156   : > { %v4337_v8 = vpop.f32.mrf.mxu2  ;;  %v4339_v33 = vpop.f32.mrf.mxu3 }
 0x157   : > { %v1872_v9 = vpop.f32.mrf.mxu0  ;;  %v1895_v50 = vpop.f32.mrf.mxu1  ;;  %v1820_v60 = vmax.f32 %v4333_v0, %v4337_v8  ;;  %v1821_v30 = vmax.f32 %v4335_v1, %v4339_v33 }
 0x158   : > { %v1947_v38 = vmax.f32 %v1814_v37, %v1872_v9  ;;  %v1948_v40 = vmax.f32 %v1815_v39, %v1895_v50 }
 0x15b   : > { %v2359_v43 = vpop.permute.xlu0 %2358 }
 0x15e   : > { %v1918_v12 = vpop.f32.mrf.mxu2  ;;  %v1941_v13 = vpop.f32.mrf.mxu3 }
 0x15f   : > { %v1875_v16 = vpop.f32.mrf.mxu0  ;;  %v1898_v51 = vpop.f32.mrf.mxu1  ;;  %v1949_v54 = vmax.f32 %v1816_v46, %v1918_v12  ;;  %v1950_v55 = vmax.f32 %v1817_v47, %v1941_v13 }
 0x160   : > { %v1951_v28 = vmax.f32 %v1818_v52, %v1875_v16  ;;  %v1952_v56 = vmax.f32 %v1819_v35, %v1898_v51 }
 0x166   : > { %v1921_v17 = vpop.f32.mrf.mxu2  ;;  %v1944_v18 = vpop.f32.mrf.mxu3 }
 0x167   : > { %v2005_v19 = vpop.f32.mrf.mxu0  ;;  %v2028_v21 = vpop.f32.mrf.mxu1  ;;  %v1953_v51 = vmax.f32 %v1820_v60, %v1921_v17 }
 0x168   : > { %v2080_v41 = vmax.f32 %v1947_v38, %v2005_v19  ;;  %v2081_v42 = vmax.f32 %v1948_v40, %v2028_v21  ;;  %v1954_v19 = vmax.f32 %v1821_v30, %v1944_v18 }
 0x16e   : > { %v2051_v14 = vpop.f32.mrf.mxu2  ;;  %v2074_v15 = vpop.f32.mrf.mxu3 }
 0x16f   : > { %v2008_v44 = vpop.f32.mrf.mxu0  ;;  %v2031_v45 = vpop.f32.mrf.mxu1  ;;  %v2082_v59 = vmax.f32 %v1949_v54, %v2051_v14  ;;  %v2083_v34 = vmax.f32 %v1950_v55, %v2074_v15 }
 0x170   : > { %v2084_v63 = vmax.f32 %v1951_v28, %v2008_v44  ;;  %v2085_v2 = vmax.f32 %v1952_v56, %v2031_v45  ;;  %v2364_v45 = vpop.permute.xlu0 %2363 }
 0x176   : > { %v4341_v22 = vpop.f32.mrf.mxu2  ;;  %v4343_v23 = vpop.f32.mrf.mxu3 }
 0x177   : > { %v2138_v24 = vpop.f32.mrf.mxu0  ;;  %v2161_v25 = vpop.f32.mrf.mxu1  ;;  %v2086_v8 = vmax.f32 %v1953_v51, %v4341_v22 }
 0x178   : > { %v2213_v31 = vmax.f32 %v2080_v41, %v2138_v24  ;;  %v2214_v61 = vmax.f32 %v2081_v42, %v2161_v25  ;;  %v2087_v25 = vmax.f32 %v1954_v19, %v4343_v23 }
 0x17e   : > { %v2184_v10 = vpop.f32.mrf.mxu2  ;;  %v2207_v11 = vpop.f32.mrf.mxu3 }
 0x17f   : > { %v2141_v26 = vpop.f32.mrf.mxu0  ;;  %v2164_v27 = vpop.f32.mrf.mxu1  ;;  %v2215_v3 = vmax.f32 %v2082_v59, %v2184_v10  ;;  %v2216_v9 = vmax.f32 %v2083_v34, %v2207_v11 }
 0x180   : > { %v2217_v4 = vmax.f32 %v2084_v63, %v2141_v26  ;;  %v2218_v5 = vmax.f32 %v2085_v2, %v2164_v27 }
 0x186   : > { %v2187_v32 = vpop.f32.mrf.mxu2  ;;  %v2210_v62 = vpop.f32.mrf.mxu3 }
 0x187   : > { %v2271_v48 = vpop.f32.mrf.mxu0  ;;  %v2294_v49 = vpop.f32.mrf.mxu1  ;;  %v2219_v26 = vmax.f32 %v2086_v8, %v2187_v32  ;;  %v2220_v37 = vmax.f32 %v2087_v25, %v2210_v62 }
 0x188   : > { %v2346_v53 = vmax.f32 %v2213_v31, %v2271_v48  ;;  %v2347_v36 = vmax.f32 %v2214_v61, %v2294_v49 }
 0x18a   : > { %v2366_v29 = vadd.f32 %v2359_v43, %v2346_v53  ;;  %v2367_v58 = vadd.f32 %v2359_v43, %v2347_v36  ;;  %v3475_v36 = vmov 512.0  }
 0x18b   : > { %3410 = vrcp.f32 %v3475_v36 }
 0x18c   : > { %v2374_v57 = vmax.f32 %v2366_v29, 0.0  ;;  %v2375_v20 = vmax.f32 %v2367_v58, 0.0 }
 0x18e   : > { %v2317_v6 = vpop.f32.mrf.mxu2  ;;  %v2340_v7 = vpop.f32.mrf.mxu3  ;;  %v2382_v15 = vmin.f32 %v2374_v57, 6.0  ;;  %v2383_v44 = vmin.f32 %v2375_v20, 6.0 }
 0x18f   : > { %v2348_v50 = vmax.f32 %v2215_v3, %v2317_v6  ;;  %v2349_v12 = vmax.f32 %v2216_v9, %v2340_v7  ;;  %v2274_v13 = vpop.f32.mrf.mxu0  ;;  %v2297_v16 = vpop.f32.mrf.mxu1 }
 0x190   : > { %v2350_v21 = vmax.f32 %v2217_v4, %v2274_v13  ;;  %v2351_v14 = vmax.f32 %v2218_v5, %v2297_v16  ;;  %v2390_v39 = vadd.f32 %v2383_v44, %v2382_v15 }
 0x191   : > { %v2368_v24 = vadd.f32 %v2359_v43, %v2348_v50  ;;  %v2369_v0 = vadd.f32 %v2359_v43, %v2349_v12  ;;  %v3411_v54 = vpop.eup %3410 }
 0x192   : > { %v2370_v1 = vadd.f32 %v2364_v45, %v2350_v21  ;;  %v2371_v33 = vadd.f32 %v2364_v45, %v2351_v14  ;;  %v2401_v55 = vmul.f32 512.0, %v3411_v54  ;;  %vm2405_vm2 = vweird.f32 %v3411_v54 }
 0x193   : > { %v2376_v10 = vmax.f32 %v2368_v24, 0.0  ;;  %v2377_v11 = vmax.f32 %v2369_v0, 0.0 }
 0x194   : > { %v2378_v27 = vmax.f32 %v2370_v1, 0.0  ;;  %v2379_v18 = vmax.f32 %v2371_v33, 0.0  ;;  %v2402_v28 = vsub.f32 1.0, %v2401_v55 }
 0x195   : > { %v2384_v17 = vmin.f32 %v2376_v10, 6.0  ;;  %v2385_v31 = vmin.f32 %v2377_v11, 6.0 }
 0x196   : > { %v2320_v38 = vpop.f32.mrf.mxu2  ;;  %v2343_v40 = vpop.f32.mrf.mxu3  ;;  %v2386_v61 = vmin.f32 %v2378_v27, 6.0  ;;  %v2387_v22 = vmin.f32 %v2379_v18, 6.0  ;;  %v2403_v56 = vmul.f32 %v3411_v54, %v2402_v28  ;;  %v4375_v18 = vld [vmem:[%s4691_s4] sm:$0xf] }
 0x197   : > { %v2352_v41 = vmax.f32 %v2219_v26, %v2320_v38  ;;  %v2353_v42 = vmax.f32 %v2220_v37, %v2343_v40  ;;  %v2391_v43 = vadd.f32 %v2390_v39, %v2384_v17  ;;  %v4370_v37 = vld [vmem:[%s4690_s3] sm:$0xf] }
 0x198   : > { %v2395_v52 = vadd.f32 %v2387_v22, %v2386_v61  ;;  %v2404_v29 = vadd.f32 %v3411_v54, %v2403_v56  ;;  %v2469_v40 = vperm.slane %v4370_v37, 0 }
 0x199   : > { %v2372_v46 = vadd.f32 %v2364_v45, %v2352_v41  ;;  %v2373_v47 = vadd.f32 %v2364_v45, %v2353_v42  ;;  %v2392_v48 = vadd.f32 %v2391_v43, %v2385_v31  ;;  %v2470_v41 = vperm.slane %v4370_v37, 1 }
 0x19a   : > { %v2406_v58 = vsel %vm2405_vm2, %v3411_v54, %v2404_v29  ;;  %v2471_v43 = vperm.slane %v4370_v37, 2 }
 0x19b   : > { %v2380_v23 = vmax.f32 %v2372_v46, 0.0  ;;  %v2381_v49 = vmax.f32 %v2373_v47, 0.0  ;;  %2393 = vadd.xlane.f32.xlu1 %v2392_v48  ;;  %v2488_v46 = vperm.slane %v4375_v18, 1  ;;  %v2489_v47 = vperm.slane %v4375_v18, 2 }
 0x19c   : > { %v2490_v48 = vperm.slane %v4375_v18, 3 }
 0x19d   : > { %v2388_v32 = vmin.f32 %v2380_v23, 6.0  ;;  %v2389_v62 = vmin.f32 %v2381_v49, 6.0 }
 0x19f   : > { %v2396_v35 = vadd.f32 %v2395_v52, %v2388_v32 }
 0x1a1   : > { %v2397_v53 = vadd.f32 %v2396_v35, %v2389_v62 }
 0x1a3   : > { %2398 = vadd.xlane.f32.xlu1 %v2397_v53 }
 0x20e   : > { %v2394_v59 = vpop.xlane.xlu1 %2393 }
 0x20f   : > { %v2407_v34 = vmul.f32 %v2406_v58, %v2394_v59 }
 0x211   : > { %v2409_v63 = vsub.f32 %v2382_v15, %v2407_v34  ;;  %v2410_v2 = vsub.f32 %v2383_v44, %v2407_v34  ;;  %v2411_v3 = vsub.f32 %v2384_v17, %v2407_v34  ;;  %v2412_v9 = vsub.f32 %v2385_v31, %v2407_v34 }
 0x213   : > { %v2417_v57 = vmul.f32 %v2409_v63, %v2409_v63  ;;  %v2418_v20 = vmul.f32 %v2410_v2, %v2410_v2  ;;  %v2419_v60 = vmul.f32 %v2411_v3, %v2411_v3  ;;  %v2420_v6 = vmul.f32 %v2412_v9, %v2412_v9 }
 0x215   : > { %v2425_v30 = vadd.f32 %v2418_v20, %v2417_v57 }
 0x216   : > { %v2399_v4 = vpop.xlane.xlu1 %2398 }
 0x217   : > { %v2408_v5 = vmul.f32 %v2406_v58, %v2399_v4  ;;  %v2426_v7 = vadd.f32 %v2425_v30, %v2419_v60 }
 0x219   : > { %v4351_v50 = vsub.f32 %v2386_v61, %v2408_v5  ;;  %v4353_v12 = vsub.f32 %v2387_v22, %v2408_v5  ;;  %v2427_v13 = vadd.f32 %v2426_v7, %v2420_v6  ;;  %v4355_v16 = vsub.f32 %v2388_v32, %v2408_v5 }
 0x21a   : > { %v4357_v51 = vsub.f32 %v2389_v62, %v2408_v5  ;;  %v2472_v61 = vperm.slane %v4370_v37, 3  ;;  %v2487_v22 = vperm.slane %v4375_v18, 0 }
 0x21b   : > { %2428 = vadd.xlane.f32.xlu2 %v2427_v13  ;;  %v2421_v19 = vmul.f32 %v4351_v50, %v4351_v50  ;;  %v2422_v21 = vmul.f32 %v4353_v12, %v4353_v12  ;;  %v2423_v14 = vmul.f32 %v4355_v16, %v4355_v16 }
 0x21c   : > { %v2424_v44 = vmul.f32 %v4357_v51, %v4357_v51 }
 0x21d   : > { %v2430_v15 = vadd.f32 %v2422_v21, %v2421_v19 }
 0x21f   : > { %v2431_v45 = vadd.f32 %v2430_v15, %v2423_v14 }
 0x221   : > { %v2432_v24 = vadd.f32 %v2431_v45, %v2424_v44 }
 0x223   : > { %2433 = vadd.xlane.f32.xlu2 %v2432_v24 }
 0x28e   : > { %v2429_v0 = vpop.xlane.xlu2 %2428 }
 0x28f   : > { %v2435_v8 = vmul.f32 %v2429_v0, %v2406_v58 }
 0x291   : > { %v2437_v1 = vadd.f32 1e-05, %v2435_v8 }
 0x293   : > { %3412 = vrsqrt.f32 %v2437_v1  ;;  %vm2445_vm4 = vweird.f32 %v2437_v1 }
 0x296   : > { %v2434_v33 = vpop.xlane.xlu2 %2433 }
 0x297   : > { %v2436_v25 = vmul.f32 %v2434_v33, %v2406_v58 }
 0x299   : > { %v3413_v10 = vpop.eup %3412  ;;  %v2438_v11 = vadd.f32 1e-05, %v2436_v25 }
 0x29a   : > { %v2440_v26 = vmul.f32 %v3413_v10, %v2437_v1  ;;  %vm2446_vm3 = vweird.f32 %v3413_v10 }
 0x29b   : > { %3414 = vrsqrt.f32 %v2438_v11  ;;  %vm2447_vm5 = vmor %vm2445_vm4, %vm2446_vm3  ;;  %vm2455_vm7 = vweird.f32 %v2438_v11 }
 0x29c   : > { %v2441_v27 = vmul.f32 %v3413_v10, %v2440_v26  ;;  %v3476_v26 = vmov -1.0  }
 0x29e   : > { %v2442_v17 = vmul.f32 0.5, %v2441_v27 }
 0x2a0   : > { %v2443_v39 = vsub.f32 1.5, %v2442_v17 }
 0x2a1   : > { %v3415_v38 = vpop.eup %3414 }
 0x2a2   : > { %v2444_v42 = vmul.f32 %v3413_v10, %v2443_v39  ;;  %v2450_v31 = vmul.f32 %v3415_v38, %v2438_v11  ;;  %vm2456_vm6 = vweird.f32 %v3415_v38 }
 0x2a3   : > { %vm2457_vm8 = vmor %vm2455_vm7, %vm2456_vm6 }
 0x2a4   : > { %v2448_v23 = vsel %vm2447_vm5, %v3413_v10, %v2444_v42  ;;  %v2451_v49 = vmul.f32 %v3415_v38, %v2450_v31 }
 0x2a5   : > { %v2459_v32 = vmul.f32 %v2448_v23, %v2409_v63  ;;  %v2460_v52 = vmul.f32 %v2448_v23, %v2410_v2  ;;  %v2461_v62 = vmul.f32 %v2448_v23, %v2411_v3  ;;  %v2462_v35 = vmul.f32 %v2448_v23, %v2412_v9 }
 0x2a6   : > { %v2452_v53 = vmul.f32 0.5, %v2451_v49 }
 0x2a7   : > { %v2477_v36 = vmul.f32 %v2469_v40, %v2459_v32  ;;  %v2478_v54 = vmul.f32 %v2470_v41, %v2460_v52  ;;  %v2479_v55 = vmul.f32 %v2471_v43, %v2461_v62  ;;  %v2480_v28 = vmul.f32 %v2472_v61, %v2462_v35 }
 0x2a8   : > { %v2453_v34 = vsub.f32 1.5, %v2452_v53 }
 0x2a9   : > { %v2495_v56 = vadd.f32 %v2487_v22, %v2477_v36  ;;  %v2496_v29 = vadd.f32 %v2488_v46, %v2478_v54  ;;  %v2497_v58 = vadd.f32 %v2489_v47, %v2479_v55  ;;  %v2498_v59 = vadd.f32 %v2490_v48, %v2480_v28 }
 0x2aa   : > { %v2454_v20 = vmul.f32 %v3415_v38, %v2453_v34 }
 0x2ab   : > { %v2511_v63 = vmul.f32 0.70710677, %v2495_v56  ;;  %v2512_v2 = vmul.f32 0.70710677, %v2496_v29  ;;  %v4401_v3 = vmul.f32 0.70710677, %v2497_v58 }
 0x2ac   : > { %v4403_v9 = vmul.f32 0.70710677, %v2498_v59  ;;  %v4409_v13 = vmul.f32 0.5, %v2495_v56  ;;  %v2458_v14 = vsel %vm2457_vm8, %v3415_v38, %v2454_v20  ;;  %v4414_v15 = vmul.f32 0.5, %v2496_v29 }
 0x2ad   : > { %v2535_v57 = vand.u32 2147483647, %v2511_v63  ;;  %v2536_v60 = vand.u32 2147483647, %v2512_v2  ;;  %v2537_v30 = vand.u32 2147483647, %v4401_v3  ;;  %v2463_v33 = vmul.f32 %v2458_v14, %v4351_v50 }
 0x2ae   : > { %v4407_v4 = vand.u32 2147483647, %v4403_v9  ;;  %v4416_v44 = vmul.f32 0.5, %v2497_v58  ;;  %vm2519_vm9 = vcmp.ge.f32.partialorder %v2511_v63, 0.0  ;;  %vm2520_vm10 = vcmp.ge.f32.partialorder %v2512_v2, 0.0 }
 0x2af   : > { %v2543_v5 = vmul.f32 0.3275911, %v2535_v57  ;;  %v2544_v6 = vmul.f32 0.3275911, %v2536_v60  ;;  %v2545_v7 = vmul.f32 0.3275911, %v2537_v30  ;;  %v2464_v11 = vmul.f32 %v2458_v14, %v4353_v12 }
 0x2b0   : > { %v2546_v19 = vmul.f32 0.3275911, %v4407_v4  ;;  %v4425_v8 = vmul.f32 0.5, %v2498_v59  ;;  %v2751_v1 = vsub.f32 0.0, %v2535_v57  ;;  %v2752_v25 = vsub.f32 0.0, %v2536_v60 }
 0x2b1   : > { %v4412_v21 = vadd.f32 1.0, %v2543_v5  ;;  %v4418_v45 = vadd.f32 1.0, %v2544_v6  ;;  %v4420_v24 = vadd.f32 1.0, %v2545_v7  ;;  %v2753_v10 = vsub.f32 0.0, %v2537_v30 }
 0x2b2   : > { %v4422_v0 = vadd.f32 1.0, %v2546_v19  ;;  %v4432_v27 = vsel %vm2519_vm9, 1.0, %v3476_v26  ;;  %v4435_v17 = vsel %vm2520_vm10, 1.0, %v3476_v26  ;;  %v2465_v38 = vmul.f32 %v2458_v14, %v4355_v16 }
 0x2b3   : > { %3416 = vrcp.f32 %v4412_v21  ;;  %v2568_v39 = vand.u32 2147483647, %v4412_v21  ;;  %v2570_v42 = vand.u32 2147483648, %v4412_v21  ;;  %v2583_v50 = vand.u32 2147483647, %v4418_v45 }
 0x2b4   : > { %3418 = vrcp.f32 %v4418_v45  ;;  %v2466_v31 = vmul.f32 %v2458_v14, %v4357_v51  ;;  %v2585_v12 = vand.u32 2147483648, %v4418_v45  ;;  %v2754_v23 = vsub.f32 0.0, %v4407_v4 }
 0x2b5   : > { %3420 = vrcp.f32 %v4420_v24  ;;  %v4445_v49 = vmul.f32 %v2751_v1, %v2535_v57  ;;  %v2481_v32 = vmul.f32 %v2469_v40, %v2463_v33  ;;  %vm2564_vm11 = vweird.f32 %v4412_v21 }
 0x2b6   : > { %3422 = vrcp.f32 %v4422_v0  ;;  %v2598_v16 = vand.u32 2147483647, %v4420_v24  ;;  %v4451_v62 = vmul.f32 %v2752_v25, %v2536_v60  ;;  %v4453_v35 = vmul.f32 %v2753_v10, %v2537_v30 }
 0x2b7   : > { %vm4456_vm12 = vcmp.eq.f32.partialorder %v2568_v39, 8.507059e+37  ;;  %vm2579_vm13 = vweird.f32 %v4418_v45  ;;  %vm2594_vm14 = vweird.f32 %v4420_v24  ;;  %v2571_v54 = vor.u32 1.1754944e-38, %v2570_v42 }
 0x2b8   : > { %vm4463_vm15 = vcmp.eq.f32.partialorder %v2583_v50, 8.507059e+37  ;;  %v2600_v56 = vand.u32 2147483648, %v4420_v24  ;;  %v2586_v58 = vor.u32 1.1754944e-38, %v2585_v12  ;;  %vm2609_vm0 = vweird.f32 %v4422_v0 }
 0x2b9   : > { %v3417_v52 = vpop.eup %3416  ;;  %vm4470_vm1 = vcmp.eq.f32.partialorder %v2598_v16, 8.507059e+37  ;;  %v2613_v57 = vand.u32 2147483647, %v4422_v0  ;;  %v2615_v20 = vand.u32 2147483648, %v4422_v0  ;;  %v2482_v19 = vmul.f32 %v2470_v41, %v2464_v11 }
 0x2ba   : > { %v3419_v53 = vpop.eup %3418  ;;  %v2560_v51 = vmul.f32 %v3417_v52, %v4412_v21  ;;  %vm2565_vm2 = vweird.f32 %v3417_v52  ;;  %v2601_v7 = vor.u32 1.1754944e-38, %v2600_v56  ;;  %v2483_v39 = vmul.f32 %v2471_v43, %v2465_v38 }
 0x2bb   : > { %v3421_v40 = vpop.eup %3420  ;;  %v2575_v55 = vmul.f32 %v3419_v53, %v4418_v45  ;;  %vm2580_vm3 = vweird.f32 %v3419_v53  ;;  %vm2566_vm5 = vmor %vm2564_vm11, %vm2565_vm2  ;;  %v2616_v10 = vor.u32 1.1754944e-38, %v2615_v20  ;;  %v2484_v42 = vmul.f32 %v2472_v61, %v2466_v31 }
 0x2bc   : > { %v2561_v29 = vsub.f32 1.0, %v2560_v51  ;;  %v2590_v59 = vmul.f32 %v3421_v40, %v4420_v24  ;;  %v3423_v34 = vpop.eup %3422  ;;  %vm2595_vm4 = vweird.f32 %v3421_v40  ;;  %vm2581_vm6 = vmor %vm2579_vm13, %vm2580_vm3  ;;  %v4495_v43 = vadd.f32 %v2487_v22, %v2481_v32 }
 0x2bd   : > { %v2576_v63 = vsub.f32 1.0, %v2575_v55  ;;  %v2605_v5 = vmul.f32 %v3423_v34, %v4422_v0  ;;  %vm2610_vm7 = vweird.f32 %v3423_v34  ;;  %vm2596_vm8 = vmor %vm2594_vm14, %vm2595_vm4  ;;  %v4499_v37 = vadd.f32 %v2488_v46, %v2482_v19 }
 0x2be   : > { %v2562_v60 = vmul.f32 %v3417_v52, %v2561_v29  ;;  %v2591_v30 = vsub.f32 1.0, %v2590_v59  ;;  %vm2611_vm9 = vmor %vm2609_vm0, %vm2610_vm7  ;;  %v4515_v46 = vadd.f32 %v2489_v47, %v2483_v39  ;;  %v4519_v32 = vadd.f32 %v2490_v48, %v2484_v42 }
 0x2bf   : > { %v2577_v6 = vmul.f32 %v3419_v53, %v2576_v63  ;;  %v2606_v33 = vsub.f32 1.0, %v2605_v5  ;;  %vm2614_vm10 = vcmp.eq.f32.partialorder %v2613_v57, 8.507059e+37  ;;  %v2767_v0 = vmul.f32 1.442695, %v4445_v49 }
 0x2c0   : > { %v2563_v14 = vadd.f32 %v3417_v52, %v2562_v60  ;;  %v2592_v1 = vmul.f32 %v3421_v40, %v2591_v30  ;;  %v4531_v48 = vmul.f32 0.70710677, %v4499_v37  ;;  %v2762_v28 = vmul.f32 %v2754_v23, %v4407_v4 }
 0x2c1   : > { %v2578_v25 = vadd.f32 %v3419_v53, %v2577_v6  ;;  %v2607_v11 = vmul.f32 %v3423_v34, %v2606_v33  ;;  %v4538_v56 = vmul.f32 0.70710677, %v4515_v46  ;;  %v4541_v49 = vmul.f32 0.70710677, %v4519_v32 }
 0x2c2   : > { %v2567_v50 = vsel %vm2566_vm5, %v3417_v52, %v2563_v14  ;;  %v2593_v41 = vadd.f32 %v3421_v40, %v2592_v1  ;;  %vm2521_vm11 = vcmp.ge.f32.partialorder %v4401_v3, 0.0  ;;  %3424 = vpow2.f32 %v2767_v0 }
 0x2c3   : > { %v4489_v12 = vsel %vm4456_vm12, %v2571_v54, %v2567_v50  ;;  %v2582_v21 = vsel %vm2581_vm6, %v3419_v53, %v2578_v25  ;;  %v2608_v38 = vadd.f32 %v3423_v34, %v2607_v11  ;;  %vm2522_vm12 = vcmp.ge.f32.partialorder %v4403_v9, 0.0 }
 0x2c4   : > { %v4503_v61 = vsel %vm4463_vm15, %v2586_v58, %v2582_v21  ;;  %v2597_v45 = vsel %vm2596_vm8, %v3421_v40, %v2593_v41  ;;  %v2679_v31 = vmul.f32 1.0614054, %v4489_v12  ;;  %v4526_v40 = vmul.f32 0.70710677, %v4495_v43 }
 0x2c5   : > { %v4508_v24 = vsel %vm4470_vm1, %v2601_v7, %v2597_v45  ;;  %v2680_v22 = vmul.f32 1.0614054, %v4503_v61  ;;  %v2612_v52 = vsel %vm2611_vm9, %v3423_v34, %v2608_v38  ;;  %v2769_v34 = vmul.f32 1.442695, %v4451_v62 }
 0x2c6   : > { %v2681_v16 = vmul.f32 1.0614054, %v4508_v24  ;;  %v2687_v53 = vadd.f32 -1.4531521, %v2679_v31  ;;  %v4522_v51 = vsel %vm2614_vm10, %v2616_v10, %v2612_v52  ;;  %v2771_v4 = vmul.f32 1.442695, %v4453_v35 }
 0x2c7   : > { %v2688_v36 = vadd.f32 -1.4531521, %v2680_v22  ;;  %v2682_v47 = vmul.f32 1.0614054, %v4522_v51  ;;  %v4549_v23 = vand.u32 2147483647, %v4526_v40  ;;  %3426 = vpow2.f32 %v2769_v34 }
 0x2c8   : > { %v2689_v54 = vadd.f32 -1.4531521, %v2681_v16  ;;  %v2695_v18 = vmul.f32 %v2687_v53, %v4489_v12  ;;  %v4554_v60 = vand.u32 2147483647, %v4531_v48  ;;  %v4558_v5 = vand.u32 2147483647, %v4538_v56  ;;  %v3425_v41 = vpop.eup %3424 }
 0x2c9   : > { %v2696_v55 = vmul.f32 %v2688_v36, %v4503_v61  ;;  %v2690_v29 = vadd.f32 -1.4531521, %v2682_v47  ;;  %v4561_v62 = vand.u32 2147483647, %v4541_v49  ;;  %v2547_v35 = vmul.f32 0.3275911, %v4549_v23 }
 0x2ca   : > { %v2697_v58 = vmul.f32 %v2689_v54, %v4508_v24  ;;  %v2703_v59 = vadd.f32 1.4214138, %v2695_v18  ;;  %v2548_v14 = vmul.f32 0.3275911, %v4554_v60  ;;  %v2773_v33 = vmul.f32 1.442695, %v2762_v28 }
 0x2cb   : > { %v2704_v63 = vadd.f32 1.4214138, %v2696_v55  ;;  %v2698_v2 = vmul.f32 %v2690_v29, %v4522_v51  ;;  %v2549_v25 = vmul.f32 0.3275911, %v4558_v5  ;;  %v4569_v50 = vadd.f32 1.0, %v2547_v35 }
 0x2cc   : > { %v2705_v57 = vadd.f32 1.4214138, %v2697_v58  ;;  %v2711_v20 = vmul.f32 %v2703_v59, %v4489_v12  ;;  %3428 = vpow2.f32 %v2771_v4  ;;  %v2550_v21 = vmul.f32 0.3275911, %v4561_v62 }
 0x2cd   : > { %v2712_v30 = vmul.f32 %v2704_v63, %v4503_v61  ;;  %v2706_v6 = vadd.f32 1.4214138, %v2698_v2  ;;  %v4573_v45 = vadd.f32 1.0, %v2548_v14  ;;  %3430 = vrcp.f32 %v4569_v50  ;;  %v3427_v54 = vpop.eup %3426 }
 0x2ce   : > { %v2713_v7 = vmul.f32 %v2705_v57, %v4508_v24  ;;  %v2719_v19 = vadd.f32 -0.28449672, %v2711_v20  ;;  %3432 = vpow2.f32 %v2773_v33  ;;  %v4577_v16 = vadd.f32 1.0, %v2549_v25 }
 0x2cf   : > { %v2720_v1 = vadd.f32 -0.28449672, %v2712_v30  ;;  %v2714_v10 = vmul.f32 %v2706_v6, %v4522_v51  ;;  %v2630_v53 = vand.u32 2147483648, %v4569_v50  ;;  %3434 = vrcp.f32 %v4573_v45 }
 0x2d0   : > { %v2721_v39 = vadd.f32 -0.28449672, %v2713_v7  ;;  %v2727_v42 = vmul.f32 %v2719_v19, %v4489_v12  ;;  %v2529_v18 = vsel %vm2521_vm11, 1.0, %v3476_v26  ;;  %v2530_v55 = vsel %vm2522_vm12, 1.0, %v3476_v26 }
 0x2d1   : > { %v2728_v11 = vmul.f32 %v2720_v1, %v4503_v61  ;;  %v2722_v38 = vadd.f32 -0.28449672, %v2714_v10  ;;  %v2628_v29 = vand.u32 2147483647, %v4569_v50  ;;  %vm2624_vm13 = vweird.f32 %v4569_v50 }
 0x2d2   : > { %v2729_v31 = vmul.f32 %v2721_v39, %v4508_v24  ;;  %v2735_v22 = vadd.f32 0.2548296, %v2727_v42  ;;  %v3429_v63 = vpop.eup %3428  ;;  %v2645_v3 = vand.u32 2147483648, %v4573_v45  ;;  %3436 = vrcp.f32 %v4577_v16 }
 0x2d3   : > { %v2736_v52 = vadd.f32 0.2548296, %v2728_v11  ;;  %v2730_v36 = vmul.f32 %v2722_v38, %v4522_v51  ;;  %v3431_v9 = vpop.eup %3430  ;;  %v2631_v20 = vor.u32 1.1754944e-38, %v2630_v53  ;;  %vm4599_vm14 = vcmp.eq.f32.partialorder %v2628_v29, 8.507059e+37 }
 0x2d4   : > { %v2737_v0 = vadd.f32 0.2548296, %v2729_v31  ;;  %v2743_v47 = vmul.f32 %v2735_v22, %v4489_v12  ;;  %v4592_v12 = vadd.f32 1.0, %v2550_v21  ;;  %v3433_v30 = vpop.eup %3432  ;;  %vm2639_vm15 = vweird.f32 %v4573_v45 }
 0x2d5   : > { %v2744_v28 = vmul.f32 %v2736_v52, %v4503_v61  ;;  %v2738_v58 = vadd.f32 0.2548296, %v2730_v36  ;;  %v2643_v7 = vand.u32 2147483647, %v4573_v45  ;;  %v3435_v19 = vpop.eup %3434  ;;  %vm2625_vm0 = vweird.f32 %v3431_v9 }
 0x2d6   : > { %v2745_v59 = vmul.f32 %v2737_v0, %v4508_v24  ;;  %v2783_v34 = vmul.f32 %v3425_v41, %v2743_v47  ;;  %v2620_v24 = vmul.f32 %v3431_v9, %v4569_v50  ;;  %v2635_v10 = vmul.f32 %v3435_v19, %v4573_v45  ;;  %vm2626_vm2 = vmor %vm2624_vm13, %vm2625_vm0 }
 0x2d7   : > { %v2784_v4 = vmul.f32 %v3427_v54, %v2744_v28  ;;  %v2746_v2 = vmul.f32 %v2738_v58, %v4522_v51  ;;  %v2646_v39 = vor.u32 1.1754944e-38, %v2645_v3  ;;  %v2658_v21 = vand.u32 2147483647, %v4577_v16 }
 0x2d8   : > { %v2785_v61 = vmul.f32 %v3429_v63, %v2745_v59  ;;  %v2791_v57 = vsub.f32 1.0, %v2783_v34  ;;  %v2621_v25 = vsub.f32 1.0, %v2620_v24  ;;  %v3437_v38 = vpop.eup %3436  ;;  %v2636_v52 = vsub.f32 1.0, %v2635_v10 }
 0x2d9   : > { %v2792_v35 = vsub.f32 1.0, %v2784_v4  ;;  %v2786_v14 = vmul.f32 %v3433_v30, %v2746_v2  ;;  %vm2640_vm1 = vweird.f32 %v3435_v19  ;;  %vm2655_vm3 = vweird.f32 %v3437_v38 }
 0x2da   : > { %v2793_v1 = vsub.f32 1.0, %v2785_v61  ;;  %v2799_v51 = vmul.f32 %v2791_v57, %v4432_v27  ;;  %v2622_v22 = vmul.f32 %v3431_v9, %v2621_v25  ;;  %v2637_v54 = vmul.f32 %v3435_v19, %v2636_v52  ;;  %vm2641_vm4 = vmor %vm2639_vm15, %vm2640_vm1 }
 0x2db   : > { %v2800_v33 = vmul.f32 %v2792_v35, %v4435_v17  ;;  %v2794_v42 = vsub.f32 1.0, %v2786_v14  ;;  %v2650_v17 = vmul.f32 %v3437_v38, %v4577_v16  ;;  %vm2644_vm5 = vcmp.eq.f32.partialorder %v2643_v7, 8.507059e+37 }
 0x2dc   : > { %v2801_v41 = vmul.f32 %v2793_v1, %v2529_v18  ;;  %v2807_v11 = vadd.f32 1.0, %v2799_v51  ;;  %v2623_v47 = vadd.f32 %v3431_v9, %v2622_v22  ;;  %v2660_v18 = vand.u32 2147483648, %v4577_v16 }
 0x2dd   : > { %v2808_v31 = vadd.f32 1.0, %v2800_v33  ;;  %v2802_v53 = vmul.f32 %v2794_v42, %v2530_v55  ;;  %v2651_v55 = vsub.f32 1.0, %v2650_v17  ;;  %v2638_v58 = vadd.f32 %v3435_v19, %v2637_v54 }
 0x2de   : > { %v2809_v27 = vadd.f32 1.0, %v2801_v41  ;;  %v2815_v36 = vmul.f32 %v2807_v11, %v4409_v13  ;;  %v2627_v13 = vsel %vm2626_vm2, %v3431_v9, %v2623_v47  ;;  %vm2654_vm6 = vweird.f32 %v4577_v16 }
 0x2df   : > { %v2816_v0 = vmul.f32 %v2808_v31, %v4414_v15  ;;  %v2810_v28 = vadd.f32 1.0, %v2802_v53  ;;  %v4621_v59 = vsel %vm4599_vm14, %v2631_v20, %v2627_v13  ;;  %v2642_v50 = vsel %vm2641_vm4, %v3435_v19, %v2638_v58  ;;  %vm2656_vm7 = vmor %vm2654_vm6, %vm2655_vm3 }
 0x2e0   : > { %v2817_v29 = vmul.f32 %v2809_v27, %v4416_v44  ;;  %3438 = vtanh.f32 %v2815_v36  ;;  %v2652_v44 = vmul.f32 %v3437_v38, %v2651_v55  ;;  %v2661_v45 = vor.u32 1.1754944e-38, %v2660_v18 }
 0x2e1   : > { %3440 = vtanh.f32 %v2816_v0  ;;  %v2818_v15 = vmul.f32 %v2810_v28, %v4425_v8  ;;  %v4632_v8 = vsel %vm2644_vm5, %v2646_v39, %v2642_v50  ;;  %v2683_v63 = vmul.f32 1.0614054, %v4621_v59 }
 0x2e2   : > { %3442 = vtanh.f32 %v2817_v29  ;;  %v2653_v34 = vadd.f32 %v3437_v38, %v2652_v44  ;;  %v2684_v4 = vmul.f32 1.0614054, %v4632_v8  ;;  %v2755_v3 = vsub.f32 0.0, %v4549_v23 }
 0x2e3   : > { %3444 = vrcp.f32 %v4592_v12  ;;  %vm2659_vm8 = vcmp.eq.f32.partialorder %v2658_v21, 8.507059e+37  ;;  %v2756_v61 = vsub.f32 0.0, %v4554_v60  ;;  %v2691_v16 = vadd.f32 -1.4531521, %v2683_v63 }
 0x2e4   : > { %3446 = vtanh.f32 %v2818_v15  ;;  %v2657_v2 = vsel %vm2656_vm7, %v3437_v38, %v2653_v34  ;;  %v2692_v30 = vadd.f32 -1.4531521, %v2684_v4  ;;  %v2757_v35 = vsub.f32 0.0, %v4558_v5 }
 0x2e5   : > { %v4640_v20 = vsel %vm2659_vm8, %v2661_v45, %v2657_v2  ;;  %v2763_v7 = vmul.f32 %v2755_v3, %v4549_v23  ;;  %v2764_v19 = vmul.f32 %v2756_v61, %v4554_v60  ;;  %v2699_v1 = vmul.f32 %v2691_v16, %v4621_v59 }
 0x2e6   : > { %v3439_v9 = vpop.eup %3438  ;;  %v2685_v6 = vmul.f32 1.0614054, %v4640_v20  ;;  %v2700_v51 = vmul.f32 %v2692_v30, %v4632_v8  ;;  %v2765_v11 = vmul.f32 %v2757_v35, %v4558_v5  ;;  %v2675_v38 = vand.u32 2147483648, %v4592_v12 }
 0x2e7   : > { %v3441_v57 = vpop.eup %3440  ;;  %2831 = vst [vmem:[%s4630_s19] sm:$0xff] %v3439_v9  ;;  %v2775_v39 = vmul.f32 1.442695, %v2763_v7  ;;  %v2707_v42 = vadd.f32 1.4214138, %v2699_v1  ;;  %v2777_v60 = vmul.f32 1.442695, %v2764_v19  ;;  %vm2669_vm10 = vweird.f32 %v4592_v12 }
 0x2e8   : > { %v3443_v24 = vpop.eup %3442  ;;  %2832 = vst [vmem:[%s4630_s19 + $0x8] sm:$0xff] %v3441_v57  ;;  %v2693_v10 = vadd.f32 -1.4531521, %v2685_v6  ;;  %v2708_v41 = vadd.f32 1.4214138, %v2700_v51  ;;  %v2676_v54 = vor.u32 1.1754944e-38, %v2675_v38 }
 0x2e9   : > { %v3445_v14 = vpop.eup %3444  ;;  %2833 = vst [vmem:[%s4630_s19 + $0x10] sm:$0xff] %v3443_v24  ;;  %v2715_v31 = vmul.f32 %v2707_v42, %v4621_v59  ;;  %v2673_v53 = vand.u32 2147483647, %v4592_v12  ;;  %3448 = vpow2.f32 %v2775_v39  ;;  %v2779_v0 = vmul.f32 1.442695, %v2765_v11 }
 0x2ea   : > { %v3447_v33 = vpop.eup %3446  ;;  %v2665_v25 = vmul.f32 %v3445_v14, %v4592_v12  ;;  %v2701_v23 = vmul.f32 %v2693_v10, %v4640_v20  ;;  %v2716_v22 = vmul.f32 %v2708_v41, %v4632_v8  ;;  %vm2670_vm9 = vweird.f32 %v3445_v14 }
 0x2eb   : > { %2834 = vst [vmem:[%s4630_s19 + $0x18] sm:$0xff] %v3447_v33  ;;  %v2723_v36 = vadd.f32 -0.28449672, %v2715_v31  ;;  %3450 = vpow2.f32 %v2777_v60  ;;  %vm2671_vm11 = vmor %vm2669_vm10, %vm2670_vm9  ;;  %vm2674_vm12 = vcmp.eq.f32.partialorder %v2673_v53, 8.507059e+37  ;;  %v2758_v13 = vsub.f32 0.0, %v4561_v62 }
 0x2ec   : > { %v2666_v21 = vsub.f32 1.0, %v2665_v25  ;;  %v2709_v27 = vadd.f32 1.4214138, %v2701_v23  ;;  %v2724_v17 = vadd.f32 -0.28449672, %v2716_v22  ;;  %3452 = vpow2.f32 %v2779_v0 }
 0x2ed   : > { %v2731_v18 = vmul.f32 %v2723_v36, %v4621_v59  ;;  %vm2523_vm13 = vcmp.ge.f32.partialorder %v4526_v40, 0.0  ;;  %vm2524_vm14 = vcmp.ge.f32.partialorder %v4531_v48, 0.0  ;;  %v2766_v2 = vmul.f32 %v2758_v13, %v4561_v62 }
 0x2ee   : > { %v2667_v52 = vmul.f32 %v3445_v14, %v2666_v21  ;;  %v2717_v47 = vmul.f32 %v2709_v27, %v4640_v20  ;;  %v2732_v28 = vmul.f32 %v2724_v17, %v4632_v8  ;;  %vm2525_vm15 = vcmp.ge.f32.partialorder %v4538_v56, 0.0 }
 0x2ef   : > { %v2739_v15 = vadd.f32 0.2548296, %v2731_v18  ;;  %v3449_v34 = vpop.eup %3448  ;;  %v2532_v40 = vsel %vm2524_vm14, 1.0, %v3476_v26  ;;  %v2781_v19 = vmul.f32 1.442695, %v2766_v2  ;;  %v2507_v62 = vmul.f32 0.5, %v4495_v43 }
 0x2f0   : > { %v2668_v5 = vadd.f32 %v3445_v14, %v2667_v52  ;;  %v2725_v55 = vadd.f32 -0.28449672, %v2717_v47  ;;  %v2740_v44 = vadd.f32 0.2548296, %v2732_v28  ;;  %v2533_v33 = vsel %vm2525_vm15, 1.0, %v3476_v26 }
 0x2f1   : > { %v2747_v45 = vmul.f32 %v2739_v15, %v4621_v59  ;;  %v3451_v4 = vpop.eup %3450  ;;  %3454 = vpow2.f32 %v2781_v19  ;;  %v2509_v11 = vmul.f32 0.5, %v4515_v46  ;;  %vm2526_vm0 = vcmp.ge.f32.partialorder %v4541_v49, 0.0 }
 0x2f2   : > { %v2672_v29 = vsel %vm2671_vm11, %v3445_v14, %v2668_v5  ;;  %v2733_v12 = vmul.f32 %v2725_v55, %v4640_v20  ;;  %v2748_v63 = vmul.f32 %v2740_v44, %v4632_v8  ;;  %v3453_v35 = vpop.eup %3452  ;;  %v2531_v8 = vsel %vm2523_vm13, 1.0, %v3476_v26 }
 0x2f3   : > { %v2677_v58 = vsel %vm2674_vm12, %v2676_v54, %v2672_v29  ;;  %v2787_v61 = vmul.f32 %v3449_v34, %v2747_v45  ;;  %v2534_v46 = vsel %vm2526_vm0, 1.0, %v3476_v26  ;;  %v2510_v17 = vmul.f32 0.5, %v4519_v32 }
 0x2f4   : > { %v2686_v50 = vmul.f32 1.0614054, %v2677_v58  ;;  %v2741_v9 = vadd.f32 0.2548296, %v2733_v12  ;;  %v2788_v57 = vmul.f32 %v3451_v4, %v2748_v63 }
 0x2f5   : > { %v2795_v59 = vsub.f32 1.0, %v2787_v61 }
 0x2f6   : > { %v2694_v3 = vadd.f32 -1.4531521, %v2686_v50  ;;  %v2749_v30 = vmul.f32 %v2741_v9, %v4640_v20  ;;  %v2796_v24 = vsub.f32 1.0, %v2788_v57  ;;  %v2508_v20 = vmul.f32 0.5, %v4499_v37 }
 0x2f7   : > { %v2803_v48 = vmul.f32 %v2795_v59, %v2531_v8  ;;  %v3455_v38 = vpop.eup %3454 }
 0x2f8   : > { %v2702_v16 = vmul.f32 %v2694_v3, %v2677_v58  ;;  %v2789_v7 = vmul.f32 %v3453_v35, %v2749_v30  ;;  %v2804_v14 = vmul.f32 %v2796_v24, %v2532_v40 }
 0x2f9   : > { %v2811_v56 = vadd.f32 1.0, %v2803_v48 }
 0x2fa   : > { %v2710_v6 = vadd.f32 1.4214138, %v2702_v16  ;;  %v2797_v51 = vsub.f32 1.0, %v2789_v7  ;;  %v2812_v25 = vadd.f32 1.0, %v2804_v14 }
 0x2fb   : > { %v2819_v42 = vmul.f32 %v2811_v56, %v2507_v62 }
 0x2fc   : > { %v2718_v1 = vmul.f32 %v2710_v6, %v2677_v58  ;;  %v2805_v39 = vmul.f32 %v2797_v51, %v2533_v33  ;;  %v2820_v41 = vmul.f32 %v2812_v25, %v2508_v20 }
 0x2fd   : > { %3456 = vtanh.f32 %v2819_v42 }
 0x2fe   : > { %v2726_v10 = vadd.f32 -0.28449672, %v2718_v1  ;;  %v2813_v23 = vadd.f32 1.0, %v2805_v39  ;;  %3458 = vtanh.f32 %v2820_v41 }
 0x300   : > { %v2734_v21 = vmul.f32 %v2726_v10, %v2677_v58  ;;  %v2821_v60 = vmul.f32 %v2813_v23, %v2509_v11 }
 0x302   : > { %v2742_v43 = vadd.f32 0.2548296, %v2734_v21  ;;  %3460 = vtanh.f32 %v2821_v60 }
 0x303   : > { %v3457_v22 = vpop.eup %3456 }
 0x304   : > { %v2750_v37 = vmul.f32 %v2742_v43, %v2677_v58  ;;  %v3459_v52 = vpop.eup %3458  ;;  %2835 = vst [vmem:[%s4630_s19 + $0x20] sm:$0xff] %v3457_v22 }
 0x305   : > { %2836 = vst [vmem:[%s4630_s19 + $0x28] sm:$0xff] %v3459_v52 }
 0x306   : > { %v2790_v31 = vmul.f32 %v3455_v38, %v2750_v37 }
 0x308   : > { %v2798_v53 = vsub.f32 1.0, %v2790_v31  ;;  %v3461_v27 = vpop.eup %3460 }
 0x309   : > { %2837 = vst [vmem:[%s4630_s19 + $0x30] sm:$0xff] %v3461_v27 }
 0x30a   : > { %v2806_v36 = vmul.f32 %v2798_v53, %v2534_v46 }
 0x30c   : > { %v2814_v0 = vadd.f32 1.0, %v2806_v36 }
 0x30e   : > { %v2822_v5 = vmul.f32 %v2814_v0, %v2510_v17 }
 0x310   : > { %3462 = vtanh.f32 %v2822_v5 }
 0x316   : > { %v3463_v47 = vpop.eup %3462 }
 0x317   : > { %2838 = vst [vmem:[%s4630_s19 + $0x38] sm:$0xff] %v3463_v47 }
 0x318 PF: > { %s15_s18 = sadd.s32 1, %s3472_s18  }
 0x319   : > { %p12_p4 = scmp.ge.s32.totalorder %s15_s18, 4  }
 0x31b   :  { %14 = sbr.rel (!%p12_p4) target bundleno = 1 (0x1), region = 85 }

</bundles_post_ra>
